<compile_context>
chip_gen: v5e
topology: v5e:2x2
jax: 0.10.0
libtpu: 0.0.40
codegen_flags: <defaults>
</compile_context>

<pallas_src>
import jax
import jax.numpy as jnp
import numpy as np
from jax.experimental import pallas as pl
from jax.experimental.pallas import tpu as pltpu

KH = 5  # both convs are 5x5


# ---------------- Pallas kernel: whole network, one launch ----------------

def _net_kernel(x_ref,
                w1_ref, b1_ref, s1_ref,
                w2_ref, b2_ref, s2_ref,
                fw1_ref, fb1_ref, fw2_ref, fb2_ref, fw3_ref, fb3_ref,
                out_ref):
    f32, bf16 = jnp.float32, jnp.bfloat16
    tb = out_ref.shape[1]                    # images handled by this program
    x = x_ref[0]                             # (tb*32, 128) f32, channels-last

    def conv_relu_pool(a, h_img, oh, w_ref, s_ref, b_ref):
        # a: (tb*h_img, 128) f32 channels-last activation (padding lanes are 0).
        # 1 MXU issue for conv (+width-pool candidates), 1 for height pooling.
        slab = jnp.concatenate(
            [jnp.concatenate(
                [a[n * h_img + di: n * h_img + di + oh, :] for n in range(tb)],
                axis=0) for di in range(KH)],
            axis=1).astype(bf16)                                     # (tb*oh, KH*128)
        y = jnp.dot(slab, w_ref[...], preferred_element_type=f32)    # (tb*oh, 256)
        m = jnp.maximum(y[:, :128], y[:, 128:])                      # width pool
        mh = jnp.dot(s_ref[...], m.astype(bf16),
                     preferred_element_type=f32)                     # stacked row select
        half = s_ref.shape[0] // 2
        rows = (oh // 2) * tb
        pooled = jnp.maximum(mh[:rows, :], mh[half:half + rows, :])  # height pool
        return jnp.maximum(pooled + b_ref[...], 0.0)                 # bias + ReLU

    # conv1 (3->6,5x5)+ReLU+pool : rows ordered (image, out_row)   -> (tb*14, 128)
    p1 = conv_relu_pool(x, 32, 28, w1_ref, s1_ref, b1_ref)
    # conv2 (6->16,5x5)+ReLU+pool: rows ordered (out_row, image)   -> (tb*5, 128)
    p2 = conv_relu_pool(p1, 14, 10, w2_ref, s2_ref, b2_ref)

    # fc1: flatten folded into 5 lane-aligned concats + one (tb,640) matmul.
    fcin = jnp.concatenate([p2[r * tb:(r + 1) * tb, :] for r in range(5)],
                           axis=1).astype(bf16)                      # (tb, 5*128)
    h = jnp.dot(fcin, fw1_ref[...], preferred_element_type=f32) + fb1_ref[...]
    h = jnp.maximum(h, 0.0)                                          # (tb,128), lanes>=120 zero
    h = jnp.dot(h.astype(bf16), fw2_ref[...],
                preferred_element_type=f32) + fb2_ref[...]
    h = jnp.maximum(h, 0.0)                                          # (tb,128), lanes>=84 zero
    logits = jnp.dot(h.astype(bf16), fw3_ref[...],
                     preferred_element_type=f32) + fb3_ref[...]      # (tb,128), lanes>=10 zero
    out_ref[...] = logits[None, :, :]                                # lane-dense store


# ---------------- one-time weight preparation (host/init time) ----------------

def _conv_weight(w, w_in):
    """Fold im2col + the kh-accumulation + width pooling into one matrix.

    Returns (KH*128, 256): K lane-block di holds the Toeplitz weights for the
    di-th row-shifted channels-last input slice (padded to 128 lanes); output
    columns [0,128) are the even conv output columns, [128,256) the odd ones,
    so 2x2 width pooling is a max of the two lane-aligned halves.
    """
    w = np.asarray(w, np.float32)
    cout, cin, kh, kw = w.shape
    ow = w_in - kw + 1
    W = np.zeros((kh * 128, 256), np.float32)
    for di in range(kh):
        for dj in range(kw):
            blk = w[:, :, di, dj].T                      # (cin, cout)
            for j in range(ow):
                r0 = di * 128 + (j + dj) * cin
                c0 = (j % 2) * 128 + (j // 2) * cout
                W[r0:r0 + cin, c0:c0 + cout] = blk
    return W


def _pool_selector(tb, oh, row_major_image):
    """Stacked 0/1 selector for 2x2 height pooling (one matmul + one max).

    Top half (sublane-aligned) selects even rows, bottom half odd rows.
    row_major_image=True orders output rows (image, row); False orders them
    (row, image) so conv2's output is already grouped for the fc1 flatten.
    """
    ohh = oh // 2
    e = tb * ohh
    pad = -(-e // 8) * 8
    S = np.zeros((2 * pad, tb * oh), np.float32)
    for n in range(tb):
        for r in range(ohh):
            o = n * ohh + r if row_major_image else r * tb + n
            S[o, n * oh + 2 * r] = 1.0
            S[pad + o, n * oh + 2 * r + 1] = 1.0
    return S


def _fc1_weight(fc1_w):
    """Permute fc1 (400,120) rows from PyTorch flatten order (c*25+i*5+j) to the
    kernel's (flatten-row, width, channel) order and place row-block i into
    K lane-block i of a (5*128, 128) matrix (output padded to 128 lanes)."""
    fc1_w = np.asarray(fc1_w, np.float32)
    W = np.zeros((5 * 128, 128), np.float32)
    for r in range(5):
        for j in range(5):
            for c in range(16):
                W[r * 128 + j * 16 + c, :120] = fc1_w[c * 25 + r * 5 + j, :]
    return W


def _pad2(a, rows, cols):
    a = np.asarray(a, np.float32)
    out = np.zeros((rows, cols), np.float32)
    out[:a.shape[0], :a.shape[1]] = a
    return out


def prepare_params(params, batch_tile=2):
    """batch_tile = images processed per program (M-stacked). Use batch_tile ==
    batch on v5e/v6e; on v7x set batch_tile = batch // 2 to shard across TCs."""
    bf16, f32 = jnp.bfloat16, jnp.float32
    tb = batch_tile
    return dict(
        w1=jnp.asarray(_conv_weight(params['conv1_w'], 32), bf16),
        b1=jnp.asarray(_pad2(np.tile(np.asarray(params['conv1_b'], np.float32), 14)[None, :], 1, 128), f32),
        s1=jnp.asarray(_pool_selector(tb, 28, row_major_image=True), bf16),
        w2=jnp.asarray(_conv_weight(params['conv2_w'], 14), bf16),
        b2=jnp.asarray(_pad2(np.tile(np.asarray(params['conv2_b'], np.float32), 5)[None, :], 1, 128), f32),
        s2=jnp.asarray(_pool_selector(tb, 10, row_major_image=False), bf16),
        fw1=jnp.asarray(_fc1_weight(params['fc1_w']), bf16),
        fb1=jnp.asarray(_pad2(np.asarray(params['fc1_b'], np.float32)[None, :], 1, 128), f32),
        fw2=jnp.asarray(_pad2(params['fc2_w'], 128, 128), bf16),
        fb2=jnp.asarray(_pad2(np.asarray(params['fc2_b'], np.float32)[None, :], 1, 128), f32),
        fw3=jnp.asarray(_pad2(params['fc3_w'], 128, 128), bf16),
        fb3=jnp.asarray(_pad2(np.asarray(params['fc3_b'], np.float32)[None, :], 1, 128), f32),
    )


# ---------------- forward wrapper (single pallas_call) ----------------

def net_forward(prepped, x):
    n, c, h, w = x.shape                                   # (N, 3, 32, 32)
    tb = prepped['s1'].shape[1] // 28                      # images per program
    assert n % tb == 0, "batch must be a multiple of batch_tile"
    g = n // tb

    x2d = jnp.transpose(x, (0, 2, 3, 1)).reshape(n * h, w * c)   # channels-last 2-D
    x2d = jnp.pad(x2d, ((0, 0), (0, 128 - w * c)))               # lane pad 96 -> 128
    x3 = x2d.reshape(g, tb * h, 128)

    weights = (prepped['w1'], prepped['b1'], prepped['s1'],
               prepped['w2'], prepped['b2'], prepped['s2'],
               prepped['fw1'], prepped['fb1'], prepped['fw2'], prepped['fb2'],
               prepped['fw3'], prepped['fb3'])

    in_specs = [pl.BlockSpec((1, tb * h, 128), lambda b: (b, 0, 0))]
    in_specs += [pl.BlockSpec(a.shape, lambda b: (0, 0)) for a in weights]

    out = pl.pallas_call(
        _net_kernel,
        grid=(g,),
        out_shape=jax.ShapeDtypeStruct((g, tb, 128), jnp.float32),
        in_specs=in_specs,
        out_specs=pl.BlockSpec((1, tb, 128), lambda b: (b, 0, 0)),
        compiler_params=pltpu.CompilerParams(
            dimension_semantics=("parallel",)),
    )(x3, *weights)
    return out.reshape(n, 128)[:, :10]


# ---------------- pure-JAX reference (for correctness check) ----------------

def _reference_forward(params, x):
    hp = jax.lax.Precision.HIGHEST
    dn = ('NCHW', 'OIHW', 'NCHW')

    def conv_relu_pool(y, w, b):
        y = jax.lax.conv_general_dilated(y, w, (1, 1), 'VALID',
                                         dimension_numbers=dn, precision=hp)
        y = jnp.maximum(y + b[None, :, None, None], 0.0)
        return jax.lax.reduce_window(y, -jnp.inf, jax.lax.max,
                                     (1, 1, 2, 2), (1, 1, 2, 2), 'VALID')

    y = conv_relu_pool(x, params['conv1_w'], params['conv1_b'])
    y = conv_relu_pool(y, params['conv2_w'], params['conv2_b'])
    y = y.reshape(y.shape[0], -1)
    y = jnp.maximum(jnp.dot(y, params['fc1_w'], precision=hp) + params['fc1_b'], 0.0)
    y = jnp.maximum(jnp.dot(y, params['fc2_w'], precision=hp) + params['fc2_b'], 0.0)
    return jnp.dot(y, params['fc3_w'], precision=hp) + params['fc3_b']


# ---------------- deterministic params + demo ----------------

def _init_params(key):
    keys = jax.random.split(key, 10)

    def u(k, shape, fan_in):
        bound = 1.0 / float(fan_in) ** 0.5
        return jax.random.uniform(k, shape, jnp.float32, -bound, bound)

    return {
        'conv1_w': u(keys[0], (6, 3, 5, 5), 3 * 5 * 5),
        'conv1_b': u(keys[1], (6,), 3 * 5 * 5),
        'conv2_w': u(keys[2], (16, 6, 5, 5), 6 * 5 * 5),
        'conv2_b': u(keys[3], (16,), 6 * 5 * 5),
        # fc weights stored as (in, out); equivalent to PyTorch (out, in) transposed.
        'fc1_w': u(keys[4], (400, 120), 400),
        'fc1_b': u(keys[5], (120,), 400),
        'fc2_w': u(keys[6], (120, 84), 120),
        'fc2_b': u(keys[7], (84,), 120),
        'fc3_w': u(keys[8], (84, 10), 84),
        'fc3_b': u(keys[9], (10,), 84),
    }


if __name__ == "__main__":
    root = jax.random.PRNGKey(0)
    pkey, xkey = jax.random.split(root)
    params = _init_params(pkey)
    # Architecture requires 3x32x32 inputs (so that flatten == 16*5*5). batch=2.
    x = jax.random.normal(xkey, (2, 3, 32, 32), jnp.float32)

    # batch_tile=2 -> whole batch M-stacked in one program (best on v5e/v6e;
    # set batch_tile=1 on v7x to shard the two images across its TensorCores).
    prepped = prepare_params(params, batch_tile=2)

    out = jax.jit(net_forward)(prepped, x)
    jax.block_until_ready(out)
    assert out.shape == (2, 10) and out.dtype == jnp.float32

    ref = _reference_forward(params, x)
    np.testing.assert_allclose(np.asarray(out), np.asarray(ref), rtol=2e-2, atol=2e-2)
    print("KERNEL_OK")
</pallas_src>

<mosaic_0001>
module attributes {stable_mosaic.version = 11 : i64} {
  func.func @_net_kernel(%arg0: i32, %arg1: memref<1x64x128xf32, #tpu.memory_space<vmem>>, %arg2: memref<640x256xbf16, #tpu.memory_space<vmem>>, %arg3: memref<1x128xf32, #tpu.memory_space<vmem>>, %arg4: memref<64x56xbf16, #tpu.memory_space<vmem>>, %arg5: memref<640x256xbf16, #tpu.memory_space<vmem>>, %arg6: memref<1x128xf32, #tpu.memory_space<vmem>>, %arg7: memref<32x20xbf16, #tpu.memory_space<vmem>>, %arg8: memref<640x128xbf16, #tpu.memory_space<vmem>>, %arg9: memref<1x128xf32, #tpu.memory_space<vmem>>, %arg10: memref<128x128xbf16, #tpu.memory_space<vmem>>, %arg11: memref<1x128xf32, #tpu.memory_space<vmem>>, %arg12: memref<128x128xbf16, #tpu.memory_space<vmem>>, %arg13: memref<1x128xf32, #tpu.memory_space<vmem>>, %arg14: memref<1x2x128xf32, #tpu.memory_space<vmem>>) attributes {dimension_semantics = [#tpu.dimension_semantics<parallel>], iteration_bounds = array<i64: 1>, scalar_prefetch = 0 : i64, scratch_operands = 0 : i64, tpu.core_type = #tpu.core_type<tc>, window_params = [{transform_indices = @transform_0, window_bounds = array<i64: 1, 64, 128>}, {pipeline_mode = #tpu.pipeline_mode<synchronous>, transform_indices = @transform_1, window_bounds = array<i64: 640, 256>}, {pipeline_mode = #tpu.pipeline_mode<synchronous>, transform_indices = @transform_2, window_bounds = array<i64: 1, 128>}, {pipeline_mode = #tpu.pipeline_mode<synchronous>, transform_indices = @transform_3, window_bounds = array<i64: 64, 56>}, {pipeline_mode = #tpu.pipeline_mode<synchronous>, transform_indices = @transform_4, window_bounds = array<i64: 640, 256>}, {pipeline_mode = #tpu.pipeline_mode<synchronous>, transform_indices = @transform_5, window_bounds = array<i64: 1, 128>}, {pipeline_mode = #tpu.pipeline_mode<synchronous>, transform_indices = @transform_6, window_bounds = array<i64: 32, 20>}, {pipeline_mode = #tpu.pipeline_mode<synchronous>, transform_indices = @transform_7, window_bounds = array<i64: 640, 128>}, {pipeline_mode = #tpu.pipeline_mode<synchronous>, transform_indices = @transform_8, window_bounds = array<i64: 1, 128>}, {pipeline_mode = #tpu.pipeline_mode<synchronous>, transform_indices = @transform_9, window_bounds = array<i64: 128, 128>}, {pipeline_mode = #tpu.pipeline_mode<synchronous>, transform_indices = @transform_10, window_bounds = array<i64: 1, 128>}, {pipeline_mode = #tpu.pipeline_mode<synchronous>, transform_indices = @transform_11, window_bounds = array<i64: 128, 128>}, {pipeline_mode = #tpu.pipeline_mode<synchronous>, transform_indices = @transform_12, window_bounds = array<i64: 1, 128>}, {transform_indices = @transform_13, window_bounds = array<i64: 1, 2, 128>}]} {
    %c0 = arith.constant 0 : index
    %c0_0 = arith.constant 0 : index
    %c0_1 = arith.constant 0 : index
    %0 = vector.load %arg1[%c0, %c0_0, %c0_1] : memref<1x64x128xf32, #tpu.memory_space<vmem>>, vector<1x64x128xf32>
    %1 = vector.shape_cast %0 : vector<1x64x128xf32> to vector<64x128xf32>
    %2 = vector.extract_strided_slice %1 {offsets = [0, 0], sizes = [28, 128], strides = [1, 1]} : vector<64x128xf32> to vector<28x128xf32>
    %3 = vector.extract_strided_slice %1 {offsets = [32, 0], sizes = [28, 128], strides = [1, 1]} : vector<64x128xf32> to vector<28x128xf32>
    %4 = tpu.concatenate %2, %3 in 0 : vector<28x128xf32>, vector<28x128xf32> -> vector<56x128xf32>
    %5 = vector.extract_strided_slice %1 {offsets = [1, 0], sizes = [28, 128], strides = [1, 1]} : vector<64x128xf32> to vector<28x128xf32>
    %6 = vector.extract_strided_slice %1 {offsets = [33, 0], sizes = [28, 128], strides = [1, 1]} : vector<64x128xf32> to vector<28x128xf32>
    %7 = tpu.concatenate %5, %6 in 0 : vector<28x128xf32>, vector<28x128xf32> -> vector<56x128xf32>
    %8 = vector.extract_strided_slice %1 {offsets = [2, 0], sizes = [28, 128], strides = [1, 1]} : vector<64x128xf32> to vector<28x128xf32>
    %9 = vector.extract_strided_slice %1 {offsets = [34, 0], sizes = [28, 128], strides = [1, 1]} : vector<64x128xf32> to vector<28x128xf32>
    %10 = tpu.concatenate %8, %9 in 0 : vector<28x128xf32>, vector<28x128xf32> -> vector<56x128xf32>
    %11 = vector.extract_strided_slice %1 {offsets = [3, 0], sizes = [28, 128], strides = [1, 1]} : vector<64x128xf32> to vector<28x128xf32>
    %12 = vector.extract_strided_slice %1 {offsets = [35, 0], sizes = [28, 128], strides = [1, 1]} : vector<64x128xf32> to vector<28x128xf32>
    %13 = tpu.concatenate %11, %12 in 0 : vector<28x128xf32>, vector<28x128xf32> -> vector<56x128xf32>
    %14 = vector.extract_strided_slice %1 {offsets = [4, 0], sizes = [28, 128], strides = [1, 1]} : vector<64x128xf32> to vector<28x128xf32>
    %15 = vector.extract_strided_slice %1 {offsets = [36, 0], sizes = [28, 128], strides = [1, 1]} : vector<64x128xf32> to vector<28x128xf32>
    %16 = tpu.concatenate %14, %15 in 0 : vector<28x128xf32>, vector<28x128xf32> -> vector<56x128xf32>
    %17 = tpu.concatenate %4, %7, %10, %13, %16 in 1 : vector<56x128xf32>, vector<56x128xf32>, vector<56x128xf32>, vector<56x128xf32>, vector<56x128xf32> -> vector<56x640xf32>
    %18 = arith.truncf %17 : vector<56x640xf32> to vector<56x640xbf16>
    %c0_2 = arith.constant 0 : index
    %c0_3 = arith.constant 0 : index
    %19 = vector.load %arg2[%c0_2, %c0_3] : memref<640x256xbf16, #tpu.memory_space<vmem>>, vector<640x256xbf16>
    %cst = arith.constant dense<0.000000e+00> : vector<56x256xf32>
    %20 = tpu.matmul %18, %19, %cst {dimension_numbers = #tpu.dot_dimension_numbers<[1], [0], [0], [1], [0, 0, 1, 1], [], []>} : vector<56x640xbf16>, vector<640x256xbf16>, vector<56x256xf32> -> vector<56x256xf32>
    %21 = vector.extract_strided_slice %20 {offsets = [0, 0], sizes = [56, 128], strides = [1, 1]} : vector<56x256xf32> to vector<56x128xf32>
    %22 = vector.extract_strided_slice %20 {offsets = [0, 128], sizes = [56, 128], strides = [1, 1]} : vector<56x256xf32> to vector<56x128xf32>
    %23 = arith.maximumf %21, %22 : vector<56x128xf32>
    %c0_4 = arith.constant 0 : index
    %c0_5 = arith.constant 0 : index
    %24 = vector.load %arg4[%c0_4, %c0_5] : memref<64x56xbf16, #tpu.memory_space<vmem>>, vector<64x56xbf16>
    %25 = arith.truncf %23 : vector<56x128xf32> to vector<56x128xbf16>
    %cst_6 = arith.constant dense<0.000000e+00> : vector<64x128xf32>
    %26 = tpu.matmul %24, %25, %cst_6 {dimension_numbers = #tpu.dot_dimension_numbers<[1], [0], [0], [1], [0, 0, 1, 1], [], []>} : vector<64x56xbf16>, vector<56x128xbf16>, vector<64x128xf32> -> vector<64x128xf32>
    %27 = vector.extract_strided_slice %26 {offsets = [0, 0], sizes = [28, 128], strides = [1, 1]} : vector<64x128xf32> to vector<28x128xf32>
    %28 = vector.extract_strided_slice %26 {offsets = [32, 0], sizes = [28, 128], strides = [1, 1]} : vector<64x128xf32> to vector<28x128xf32>
    %29 = arith.maximumf %27, %28 : vector<28x128xf32>
    %c0_7 = arith.constant 0 : index
    %c0_8 = arith.constant 0 : index
    %30 = vector.load %arg3[%c0_7, %c0_8] : memref<1x128xf32, #tpu.memory_space<vmem>>, vector<1x128xf32>
    %31 = vector.broadcast %30 : vector<1x128xf32> to vector<28x128xf32>
    %32 = arith.addf %29, %31 : vector<28x128xf32>
    %cst_9 = arith.constant 0.000000e+00 : f32
    %33 = vector.broadcast %cst_9 : f32 to vector<28x128xf32>
    %34 = arith.maximumf %32, %33 : vector<28x128xf32>
    %35 = vector.extract_strided_slice %34 {offsets = [0, 0], sizes = [10, 128], strides = [1, 1]} : vector<28x128xf32> to vector<10x128xf32>
    %36 = vector.extract_strided_slice %34 {offsets = [14, 0], sizes = [10, 128], strides = [1, 1]} : vector<28x128xf32> to vector<10x128xf32>
    %37 = tpu.concatenate %35, %36 in 0 : vector<10x128xf32>, vector<10x128xf32> -> vector<20x128xf32>
    %38 = vector.extract_strided_slice %34 {offsets = [1, 0], sizes = [10, 128], strides = [1, 1]} : vector<28x128xf32> to vector<10x128xf32>
    %39 = vector.extract_strided_slice %34 {offsets = [15, 0], sizes = [10, 128], strides = [1, 1]} : vector<28x128xf32> to vector<10x128xf32>
    %40 = tpu.concatenate %38, %39 in 0 : vector<10x128xf32>, vector<10x128xf32> -> vector<20x128xf32>
    %41 = vector.extract_strided_slice %34 {offsets = [2, 0], sizes = [10, 128], strides = [1, 1]} : vector<28x128xf32> to vector<10x128xf32>
    %42 = vector.extract_strided_slice %34 {offsets = [16, 0], sizes = [10, 128], strides = [1, 1]} : vector<28x128xf32> to vector<10x128xf32>
    %43 = tpu.concatenate %41, %42 in 0 : vector<10x128xf32>, vector<10x128xf32> -> vector<20x128xf32>
    %44 = vector.extract_strided_slice %34 {offsets = [3, 0], sizes = [10, 128], strides = [1, 1]} : vector<28x128xf32> to vector<10x128xf32>
    %45 = vector.extract_strided_slice %34 {offsets = [17, 0], sizes = [10, 128], strides = [1, 1]} : vector<28x128xf32> to vector<10x128xf32>
    %46 = tpu.concatenate %44, %45 in 0 : vector<10x128xf32>, vector<10x128xf32> -> vector<20x128xf32>
    %47 = vector.extract_strided_slice %34 {offsets = [4, 0], sizes = [10, 128], strides = [1, 1]} : vector<28x128xf32> to vector<10x128xf32>
    %48 = vector.extract_strided_slice %34 {offsets = [18, 0], sizes = [10, 128], strides = [1, 1]} : vector<28x128xf32> to vector<10x128xf32>
    %49 = tpu.concatenate %47, %48 in 0 : vector<10x128xf32>, vector<10x128xf32> -> vector<20x128xf32>
    %50 = tpu.concatenate %37, %40, %43, %46, %49 in 1 : vector<20x128xf32>, vector<20x128xf32>, vector<20x128xf32>, vector<20x128xf32>, vector<20x128xf32> -> vector<20x640xf32>
    %51 = arith.truncf %50 : vector<20x640xf32> to vector<20x640xbf16>
    %c0_10 = arith.constant 0 : index
    %c0_11 = arith.constant 0 : index
    %52 = vector.load %arg5[%c0_10, %c0_11] : memref<640x256xbf16, #tpu.memory_space<vmem>>, vector<640x256xbf16>
    %cst_12 = arith.constant dense<0.000000e+00> : vector<20x256xf32>
    %53 = tpu.matmul %51, %52, %cst_12 {dimension_numbers = #tpu.dot_dimension_numbers<[1], [0], [0], [1], [0, 0, 1, 1], [], []>} : vector<20x640xbf16>, vector<640x256xbf16>, vector<20x256xf32> -> vector<20x256xf32>
    %54 = vector.extract_strided_slice %53 {offsets = [0, 0], sizes = [20, 128], strides = [1, 1]} : vector<20x256xf32> to vector<20x128xf32>
    %55 = vector.extract_strided_slice %53 {offsets = [0, 128], sizes = [20, 128], strides = [1, 1]} : vector<20x256xf32> to vector<20x128xf32>
    %56 = arith.maximumf %54, %55 : vector<20x128xf32>
    %c0_13 = arith.constant 0 : index
    %c0_14 = arith.constant 0 : index
    %57 = vector.load %arg7[%c0_13, %c0_14] : memref<32x20xbf16, #tpu.memory_space<vmem>>, vector<32x20xbf16>
    %58 = arith.truncf %56 : vector<20x128xf32> to vector<20x128xbf16>
    %cst_15 = arith.constant dense<0.000000e+00> : vector<32x128xf32>
    %59 = tpu.matmul %57, %58, %cst_15 {dimension_numbers = #tpu.dot_dimension_numbers<[1], [0], [0], [1], [0, 0, 1, 1], [], []>} : vector<32x20xbf16>, vector<20x128xbf16>, vector<32x128xf32> -> vector<32x128xf32>
    %60 = vector.extract_strided_slice %59 {offsets = [0, 0], sizes = [10, 128], strides = [1, 1]} : vector<32x128xf32> to vector<10x128xf32>
    %61 = vector.extract_strided_slice %59 {offsets = [16, 0], sizes = [10, 128], strides = [1, 1]} : vector<32x128xf32> to vector<10x128xf32>
    %62 = arith.maximumf %60, %61 : vector<10x128xf32>
    %c0_16 = arith.constant 0 : index
    %c0_17 = arith.constant 0 : index
    %63 = vector.load %arg6[%c0_16, %c0_17] : memref<1x128xf32, #tpu.memory_space<vmem>>, vector<1x128xf32>
    %64 = vector.broadcast %63 : vector<1x128xf32> to vector<10x128xf32>
    %65 = arith.addf %62, %64 : vector<10x128xf32>
    %cst_18 = arith.constant 0.000000e+00 : f32
    %66 = vector.broadcast %cst_18 : f32 to vector<10x128xf32>
    %67 = arith.maximumf %65, %66 : vector<10x128xf32>
    %68 = vector.extract_strided_slice %67 {offsets = [0, 0], sizes = [2, 128], strides = [1, 1]} : vector<10x128xf32> to vector<2x128xf32>
    %69 = vector.extract_strided_slice %67 {offsets = [2, 0], sizes = [2, 128], strides = [1, 1]} : vector<10x128xf32> to vector<2x128xf32>
    %70 = vector.extract_strided_slice %67 {offsets = [4, 0], sizes = [2, 128], strides = [1, 1]} : vector<10x128xf32> to vector<2x128xf32>
    %71 = vector.extract_strided_slice %67 {offsets = [6, 0], sizes = [2, 128], strides = [1, 1]} : vector<10x128xf32> to vector<2x128xf32>
    %72 = vector.extract_strided_slice %67 {offsets = [8, 0], sizes = [2, 128], strides = [1, 1]} : vector<10x128xf32> to vector<2x128xf32>
    %73 = tpu.concatenate %68, %69, %70, %71, %72 in 1 : vector<2x128xf32>, vector<2x128xf32>, vector<2x128xf32>, vector<2x128xf32>, vector<2x128xf32> -> vector<2x640xf32>
    %74 = arith.truncf %73 : vector<2x640xf32> to vector<2x640xbf16>
    %c0_19 = arith.constant 0 : index
    %c0_20 = arith.constant 0 : index
    %75 = vector.load %arg8[%c0_19, %c0_20] : memref<640x128xbf16, #tpu.memory_space<vmem>>, vector<640x128xbf16>
    %cst_21 = arith.constant dense<0.000000e+00> : vector<2x128xf32>
    %76 = tpu.matmul %74, %75, %cst_21 {dimension_numbers = #tpu.dot_dimension_numbers<[1], [0], [0], [1], [0, 0, 1, 1], [], []>} : vector<2x640xbf16>, vector<640x128xbf16>, vector<2x128xf32> -> vector<2x128xf32>
    %c0_22 = arith.constant 0 : index
    %c0_23 = arith.constant 0 : index
    %77 = vector.load %arg9[%c0_22, %c0_23] : memref<1x128xf32, #tpu.memory_space<vmem>>, vector<1x128xf32>
    %78 = vector.broadcast %77 : vector<1x128xf32> to vector<2x128xf32>
    %79 = arith.addf %76, %78 : vector<2x128xf32>
    %cst_24 = arith.constant 0.000000e+00 : f32
    %80 = vector.broadcast %cst_24 : f32 to vector<2x128xf32>
    %81 = arith.maximumf %79, %80 : vector<2x128xf32>
    %82 = arith.truncf %81 : vector<2x128xf32> to vector<2x128xbf16>
    %c0_25 = arith.constant 0 : index
    %c0_26 = arith.constant 0 : index
    %83 = vector.load %arg10[%c0_25, %c0_26] : memref<128x128xbf16, #tpu.memory_space<vmem>>, vector<128x128xbf16>
    %cst_27 = arith.constant dense<0.000000e+00> : vector<2x128xf32>
    %84 = tpu.matmul %82, %83, %cst_27 {dimension_numbers = #tpu.dot_dimension_numbers<[1], [0], [0], [1], [0, 0, 1, 1], [], []>} : vector<2x128xbf16>, vector<128x128xbf16>, vector<2x128xf32> -> vector<2x128xf32>
    %c0_28 = arith.constant 0 : index
    %c0_29 = arith.constant 0 : index
    %85 = vector.load %arg11[%c0_28, %c0_29] : memref<1x128xf32, #tpu.memory_space<vmem>>, vector<1x128xf32>
    %86 = vector.broadcast %85 : vector<1x128xf32> to vector<2x128xf32>
    %87 = arith.addf %84, %86 : vector<2x128xf32>
    %cst_30 = arith.constant 0.000000e+00 : f32
    %88 = vector.broadcast %cst_30 : f32 to vector<2x128xf32>
    %89 = arith.maximumf %87, %88 : vector<2x128xf32>
    %90 = arith.truncf %89 : vector<2x128xf32> to vector<2x128xbf16>
    %c0_31 = arith.constant 0 : index
    %c0_32 = arith.constant 0 : index
    %91 = vector.load %arg12[%c0_31, %c0_32] : memref<128x128xbf16, #tpu.memory_space<vmem>>, vector<128x128xbf16>
    %cst_33 = arith.constant dense<0.000000e+00> : vector<2x128xf32>
    %92 = tpu.matmul %90, %91, %cst_33 {dimension_numbers = #tpu.dot_dimension_numbers<[1], [0], [0], [1], [0, 0, 1, 1], [], []>} : vector<2x128xbf16>, vector<128x128xbf16>, vector<2x128xf32> -> vector<2x128xf32>
    %c0_34 = arith.constant 0 : index
    %c0_35 = arith.constant 0 : index
    %93 = vector.load %arg13[%c0_34, %c0_35] : memref<1x128xf32, #tpu.memory_space<vmem>>, vector<1x128xf32>
    %94 = vector.broadcast %93 : vector<1x128xf32> to vector<2x128xf32>
    %95 = arith.addf %92, %94 : vector<2x128xf32>
    %96 = vector.shape_cast %95 : vector<2x128xf32> to vector<1x2x128xf32>
    %c0_36 = arith.constant 0 : index
    %c0_37 = arith.constant 0 : index
    %c0_38 = arith.constant 0 : index
    %97 = vector.load %arg14[%c0_36, %c0_37, %c0_38] : memref<1x2x128xf32, #tpu.memory_space<vmem>>, vector<1x2x128xf32>
    tpu.vector_store %arg14[%c0_36, %c0_37, %c0_38], %96 {strides = array<i32>} : memref<1x2x128xf32, #tpu.memory_space<vmem>>, vector<1x2x128xf32>,
    return
  }
  func.func @transform_0(%arg0: i32) -> (i32, i32, i32) {
    %c0_i32 = arith.constant 0 : i32
    %c0_i32_0 = arith.constant 0 : i32
    %c0_i32_1 = arith.constant 0 : i32
    return %arg0, %c0_i32, %c0_i32_0 : i32, i32, i32
  }
  func.func @transform_1(%arg0: i32) -> (i32, i32) {
    %c0_i32 = arith.constant 0 : i32
    %c0_i32_0 = arith.constant 0 : i32
    %c0_i32_1 = arith.constant 0 : i32
    return %c0_i32, %c0_i32_0 : i32, i32
  }
  func.func @transform_2(%arg0: i32) -> (i32, i32) {
    %c0_i32 = arith.constant 0 : i32
    %c0_i32_0 = arith.constant 0 : i32
    %c0_i32_1 = arith.constant 0 : i32
    return %c0_i32, %c0_i32_0 : i32, i32
  }
  func.func @transform_3(%arg0: i32) -> (i32, i32) {
    %c0_i32 = arith.constant 0 : i32
    %c0_i32_0 = arith.constant 0 : i32
    %c0_i32_1 = arith.constant 0 : i32
    return %c0_i32, %c0_i32_0 : i32, i32
  }
  func.func @transform_4(%arg0: i32) -> (i32, i32) {
    %c0_i32 = arith.constant 0 : i32
    %c0_i32_0 = arith.constant 0 : i32
    %c0_i32_1 = arith.constant 0 : i32
    return %c0_i32, %c0_i32_0 : i32, i32
  }
  func.func @transform_5(%arg0: i32) -> (i32, i32) {
    %c0_i32 = arith.constant 0 : i32
    %c0_i32_0 = arith.constant 0 : i32
    %c0_i32_1 = arith.constant 0 : i32
    return %c0_i32, %c0_i32_0 : i32, i32
  }
  func.func @transform_6(%arg0: i32) -> (i32, i32) {
    %c0_i32 = arith.constant 0 : i32
    %c0_i32_0 = arith.constant 0 : i32
    %c0_i32_1 = arith.constant 0 : i32
    return %c0_i32, %c0_i32_0 : i32, i32
  }
  func.func @transform_7(%arg0: i32) -> (i32, i32) {
    %c0_i32 = arith.constant 0 : i32
    %c0_i32_0 = arith.constant 0 : i32
    %c0_i32_1 = arith.constant 0 : i32
    return %c0_i32, %c0_i32_0 : i32, i32
  }
  func.func @transform_8(%arg0: i32) -> (i32, i32) {
    %c0_i32 = arith.constant 0 : i32
    %c0_i32_0 = arith.constant 0 : i32
    %c0_i32_1 = arith.constant 0 : i32
    return %c0_i32, %c0_i32_0 : i32, i32
  }
  func.func @transform_9(%arg0: i32) -> (i32, i32) {
    %c0_i32 = arith.constant 0 : i32
    %c0_i32_0 = arith.constant 0 : i32
    %c0_i32_1 = arith.constant 0 : i32
    return %c0_i32, %c0_i32_0 : i32, i32
  }
  func.func @transform_10(%arg0: i32) -> (i32, i32) {
    %c0_i32 = arith.constant 0 : i32
    %c0_i32_0 = arith.constant 0 : i32
    %c0_i32_1 = arith.constant 0 : i32
    return %c0_i32, %c0_i32_0 : i32, i32
  }
  func.func @transform_11(%arg0: i32) -> (i32, i32) {
    %c0_i32 = arith.constant 0 : i32
    %c0_i32_0 = arith.constant 0 : i32
    %c0_i32_1 = arith.constant 0 : i32
    return %c0_i32, %c0_i32_0 : i32, i32
  }
  func.func @transform_12(%arg0: i32) -> (i32, i32) {
    %c0_i32 = arith.constant 0 : i32
    %c0_i32_0 = arith.constant 0 : i32
    %c0_i32_1 = arith.constant 0 : i32
    return %c0_i32, %c0_i32_0 : i32, i32
  }
  func.func @transform_13(%arg0: i32) -> (i32, i32, i32) {
    %c0_i32 = arith.constant 0 : i32
    %c0_i32_0 = arith.constant 0 : i32
    %c0_i32_1 = arith.constant 0 : i32
    return %arg0, %c0_i32, %c0_i32_0 : i32, i32, i32
  }
}

</mosaic_0001>

<bundles_post_ra>
// kernel: net_forward.1
= control target key start
LH: loop header
LB: loop body
LE: loop exit
PB: predicated region body
PF: predicated region fallthrough
CT: control target
= control target key end

     0   :  { %18 = vsyncpa [#allocation3], 0  ;;  %s4666_s0 = inlined_call_operand.vmem [shape: f32[1,64,128], index: 0, kind: input, shape index: {}]   ;;  %s4667_s1 = inlined_call_operand.vmem [shape: bf16[640,256], index: 1, kind: input, shape index: {}]   ;;  %s4668_s2 = inlined_call_operand.vmem [shape: f32[1,128], index: 2, kind: input, shape index: {}]   ;;  %s4669_s3 = inlined_call_operand.vmem [shape: bf16[64,56], index: 3, kind: input, shape index: {}]   ;;  %s4670_s4 = inlined_call_operand.hbm [shape: bf16[640,256], index: 4, kind: input, shape index: {}]   ;;  %s4671_s5 = inlined_call_operand.vmem [shape: f32[1,128], index: 5, kind: input, shape index: {}]   ;;  %s4672_s6 = inlined_call_operand.vmem [shape: bf16[32,20], index: 6, kind: input, shape index: {}]   ;;  %s4673_s7 = inlined_call_operand.hbm [shape: bf16[640,128], index: 7, kind: input, shape index: {}]   ;;  %s4674_s8 = inlined_call_operand.vmem [shape: f32[1,128], index: 8, kind: input, shape index: {}]   ;;  %s4675_s9 = inlined_call_operand.vmem [shape: bf16[128,128], index: 9, kind: input, shape index: {}]   ;;  %s4676_s10 = inlined_call_operand.vmem [shape: f32[1,128], index: 10, kind: input, shape index: {}]   ;;  %s4677_s11 = inlined_call_operand.vmem [shape: bf16[128,128], index: 11, kind: input, shape index: {}]   ;;  %s4678_s12 = inlined_call_operand.vmem [shape: f32[1,128], index: 12, kind: input, shape index: {}]   ;;  %s4679_s13 = inlined_call_operand.hbm [shape: f32[1,2,128], index: 13, kind: output, shape index: {}]  }
   0x1   :  { %19 = vsyncpa [#allocation6], 0 }
   0x2   :  { %20 = vsyncpa [#allocation4], 0  ;;  %s33_s27 = sshll.u32 %s4670_s4, 4  ;;  %s3644_s28 = smov [#allocation2]   ;;  %s34_s27 = int_to_ptr.hbm [resolvable:$true] %s33_s27 }
   0x3   :  { %s35_s29 = sshll.u32 %s3644_s28, 4  ;;  %s50_s15 = sshll.u32 %s4673_s7, 4  ;;  %s36_s29 = int_to_ptr.vmem [resolvable:$true] %s35_s29  ;;  %s51_s15 = int_to_ptr.hbm [resolvable:$true] %s50_s15 }
   0x4   :  { %s3645_s16 = smov 128   ;;  %s3646_s17 = smov 8  }
   0x5   :  { %41 = dma.hbm_to_vmem [thread:$0]  %s34_s27, 10240, %s36_s29, [#allocation3], %s3645_s16, %s3645_s16, %s3646_s17  }
   0x6   :  { %s3647_s18 = smov [#allocation5]   ;;  %s3648_s20 = smov 64  }
   0x7   :  { %s52_s19 = sshll.u32 %s3647_s18, 4  ;;  %s3649_s21 = smov 4   ;;  %s53_s19 = int_to_ptr.vmem [resolvable:$true] %s52_s19 }
   0x8   :  { %58 = dma.hbm_to_vmem [thread:$0]  %s51_s15, 5120, %s53_s19, [#allocation6], %s3648_s20, %s3648_s20, %s3649_s21  }
   0x9   :  { %3638 = dma.done.wait [#allocation3], 10240  }
   0xa   :  { %3639 = vsyncadd [#allocation3], 4294957056 }
   0xb   :  { %3640 = dma.done.wait [#allocation6], 5120  }
   0xc   :  { %3641 = vsyncadd [#allocation6], 4294962176  ;;  %v2496_v0 = vld [vmem:[%s4667_s1 + $0x70] sm:$0xf]  ;;  %v3347_v1 = vld [vmem:[%s4667_s1 + $0x74] sm:$0xf0] }
   0xd   :  { %v2560_v2 = vld [vmem:[%s4667_s1 + $0xf0] sm:$0xf]  ;;  %v2497_v3 = vor.u32 %v3347_v1, %v2496_v0  ;;  %v3363_v4 = vld [vmem:[%s4667_s1 + $0xf4] sm:$0xf0]  ;;  %v2488_v11 = vld [vmem:[%s4667_s1 + $0x60] sm:$0xf] }
   0xe   :  { %v2624_v5 = vld [vmem:[%s4667_s1 + $0x170] sm:$0xf]  ;;  %v3379_v6 = vld [vmem:[%s4667_s1 + $0x174] sm:$0xf0]  ;;  %v2561_v7 = vor.u32 %v3363_v4, %v2560_v2  ;;  %v3345_v13 = vld [vmem:[%s4667_s1 + $0x64] sm:$0xf0] }
   0xf   :  { %v2625_v8 = vor.u32 %v3379_v6, %v2624_v5  ;;  %v2688_v9 = vld [vmem:[%s4667_s1 + $0x1f0] sm:$0xf]  ;;  %v3395_v10 = vld [vmem:[%s4667_s1 + $0x1f4] sm:$0xf0]  ;;  %694 = vmatpush.bf16.msra.mxu0 %v2497_v3  ;;  %v2552_v14 = vld [vmem:[%s4667_s1 + $0xe0] sm:$0xf]  ;;  %v2489_v16 = vor.u32 %v3345_v13, %v2488_v11 }
  0x10   :  { %v2689_v12 = vor.u32 %v3395_v10, %v2688_v9  ;;  %v3361_v15 = vld [vmem:[%s4667_s1 + $0xe4] sm:$0xf0]  ;;  %722 = vmatpush.bf16.msra.mxu1 %v2561_v7  ;;  %v2616_v18 = vld [vmem:[%s4667_s1 + $0x160] sm:$0xf]  ;;  %v2480_v23 = vld [vmem:[%s4667_s1 + $0x50] sm:$0xf] }
  0x11   :  { %750 = vmatpush.bf16.msra.mxu2 %v2625_v8  ;;  %v2553_v17 = vor.u32 %v3361_v15, %v2552_v14  ;;  %v3377_v19 = vld [vmem:[%s4667_s1 + $0x164] sm:$0xf0]  ;;  %v2680_v20 = vld [vmem:[%s4667_s1 + $0x1e0] sm:$0xf]  ;;  %v3343_v24 = vld [vmem:[%s4667_s1 + $0x54] sm:$0xf0] }
  0x12   :  { %778 = vmatpush.bf16.msra.mxu3 %v2689_v12  ;;  %v2617_v21 = vor.u32 %v3377_v19, %v2616_v18  ;;  %v3393_v22 = vld [vmem:[%s4667_s1 + $0x1e4] sm:$0xf0]  ;;  %v2544_v26 = vld [vmem:[%s4667_s1 + $0xd0] sm:$0xf]  ;;  %v3359_v27 = vld [vmem:[%s4667_s1 + $0xd4] sm:$0xf0]  ;;  %v2481_v29 = vor.u32 %v3343_v24, %v2480_v23 }
  0x13   :  { %v2681_v25 = vor.u32 %v3393_v22, %v2680_v20  ;;  %v2608_v28 = vld [vmem:[%s4667_s1 + $0x150] sm:$0xf]  ;;  %695 = vmatpush.bf16.msra.mxu0 %v2489_v16  ;;  %v3375_v30 = vld [vmem:[%s4667_s1 + $0x154] sm:$0xf0]  ;;  %v2545_v33 = vor.u32 %v3359_v27, %v2544_v26  ;;  %v2472_v35 = vld [vmem:[%s4667_s1 + $0x40] sm:$0xf] }
  0x14   :  { %v2672_v31 = vld [vmem:[%s4667_s1 + $0x1d0] sm:$0xf]  ;;  %v3391_v32 = vld [vmem:[%s4667_s1 + $0x1d4] sm:$0xf0]  ;;  %723 = vmatpush.bf16.msra.mxu1 %v2553_v17  ;;  %v2609_v34 = vor.u32 %v3375_v30, %v2608_v28  ;;  %v3341_v36 = vld [vmem:[%s4667_s1 + $0x44] sm:$0xf0] }
  0x15   :  { %751 = vmatpush.bf16.msra.mxu2 %v2617_v21  ;;  %v2536_v37 = vld [vmem:[%s4667_s1 + $0xc0] sm:$0xf]  ;;  %v2673_v38 = vor.u32 %v3391_v32, %v2672_v31  ;;  %v3357_v39 = vld [vmem:[%s4667_s1 + $0xc4] sm:$0xf0]  ;;  %v2473_v44 = vor.u32 %v3341_v36, %v2472_v35  ;;  %v2464_v47 = vld [vmem:[%s4667_s1 + $0x30] sm:$0xf] }
  0x16   :  { %779 = vmatpush.bf16.msra.mxu3 %v2681_v25  ;;  %v2600_v40 = vld [vmem:[%s4667_s1 + $0x140] sm:$0xf]  ;;  %v3373_v41 = vld [vmem:[%s4667_s1 + $0x144] sm:$0xf0]  ;;  %v2537_v45 = vor.u32 %v3357_v39, %v2536_v37  ;;  %v3339_v48 = vld [vmem:[%s4667_s1 + $0x34] sm:$0xf0] }
  0x17   :  { %v2664_v42 = vld [vmem:[%s4667_s1 + $0x1c0] sm:$0xf]  ;;  %v3389_v43 = vld [vmem:[%s4667_s1 + $0x1c4] sm:$0xf0]  ;;  %696 = vmatpush.bf16.msra.mxu0 %v2481_v29  ;;  %v2601_v46 = vor.u32 %v3373_v41, %v2600_v40  ;;  %v2528_v49 = vld [vmem:[%s4667_s1 + $0xb0] sm:$0xf]  ;;  %v2465_v56 = vor.u32 %v3339_v48, %v2464_v47 }
  0x18   :  { %724 = vmatpush.bf16.msra.mxu1 %v2545_v33  ;;  %v2665_v50 = vor.u32 %v3389_v43, %v2664_v42  ;;  %v3355_v51 = vld [vmem:[%s4667_s1 + $0xb4] sm:$0xf0]  ;;  %v2592_v52 = vld [vmem:[%s4667_s1 + $0x130] sm:$0xf]  ;;  %v2456_v59 = vld [vmem:[%s4667_s1 + $0x20] sm:$0xf] }
  0x19   :  { %752 = vmatpush.bf16.msra.mxu2 %v2609_v34  ;;  %v3371_v53 = vld [vmem:[%s4667_s1 + $0x134] sm:$0xf0]  ;;  %v2656_v54 = vld [vmem:[%s4667_s1 + $0x1b0] sm:$0xf]  ;;  %v2529_v57 = vor.u32 %v3355_v51, %v2528_v49  ;;  %v3337_v60 = vld [vmem:[%s4667_s1 + $0x24] sm:$0xf0] }
  0x1a   :  { %780 = vmatpush.bf16.msra.mxu3 %v2673_v38  ;;  %v3387_v55 = vld [vmem:[%s4667_s1 + $0x1b4] sm:$0xf0]  ;;  %v2593_v58 = vor.u32 %v3371_v53, %v2592_v52  ;;  %v2520_v61 = vld [vmem:[%s4667_s1 + $0xa0] sm:$0xf]  ;;  %v3353_v63 = vld [vmem:[%s4667_s1 + $0xa4] sm:$0xf0]  ;;  %v2457_v5 = vor.u32 %v3337_v60, %v2456_v59 }
  0x1b   :  { %697 = vmatpush.bf16.msra.mxu0 %v2473_v44  ;;  %v2657_v62 = vor.u32 %v3387_v55, %v2656_v54  ;;  %v2584_v0 = vld [vmem:[%s4667_s1 + $0x120] sm:$0xf]  ;;  %v3369_v1 = vld [vmem:[%s4667_s1 + $0x124] sm:$0xf0]  ;;  %v2448_v4 = vld [vmem:[%s4667_s1 + $0x10] sm:$0xf]  ;;  %v2521_v9 = vor.u32 %v3353_v63, %v2520_v61 }
  0x1c   :  { %725 = vmatpush.bf16.msra.mxu1 %v2537_v45  ;;  %v2648_v2 = vld [vmem:[%s4667_s1 + $0x1a0] sm:$0xf]  ;;  %v3385_v3 = vld [vmem:[%s4667_s1 + $0x1a4] sm:$0xf0]  ;;  %v3335_v6 = vld [vmem:[%s4667_s1 + $0x14] sm:$0xf0]  ;;  %v2585_v10 = vor.u32 %v3369_v1, %v2584_v0 }
  0x1d   :  { %753 = vmatpush.bf16.msra.mxu2 %v2601_v46  ;;  %v2512_v7 = vld [vmem:[%s4667_s1 + $0x90] sm:$0xf]  ;;  %v3351_v8 = vld [vmem:[%s4667_s1 + $0x94] sm:$0xf0]  ;;  %v2649_v14 = vor.u32 %v3385_v3, %v2648_v2  ;;  %v3898_v16 = vld [vmem:[%s4666_s0] sm:$0xff]  ;;  %vm107_vm0 = vcmask 1046528   ;;  %v2449_v18 = vor.u32 %v3335_v6, %v2448_v4 }
  0x1e   :  { %781 = vmatpush.bf16.msra.mxu3 %v2665_v50  ;;  %v2576_v11 = vld [vmem:[%s4667_s1 + $0x110] sm:$0xf]  ;;  %v3367_v12 = vld [vmem:[%s4667_s1 + $0x114] sm:$0xf0]  ;;  %v3903_v17 = vld [vmem:[%s4666_s0 + $0x8] sm:$0xff]  ;;  %v2513_v19 = vor.u32 %v3351_v8, %v2512_v7  ;;  %vm132_vm1 = vcmask 1045504  }
  0x1f   :  { %698 = vmatpush.bf16.msra.mxu0 %v2465_v56  ;;  %v2640_v13 = vld [vmem:[%s4667_s1 + $0x190] sm:$0xf]  ;;  %v3383_v15 = vld [vmem:[%s4667_s1 + $0x194] sm:$0xf0]  ;;  %v2440_v20 = vld [vmem:[%s4667_s1] sm:$0xf]  ;;  %v2577_v26 = vor.u32 %v3367_v12, %v2576_v11  ;;  %v3957_v50 = vpack.c.bf16 %v3903_v17, %v3898_v16 }
  0x20   :  { %726 = vmatpush.bf16.msra.mxu1 %v2529_v57  ;;  %v3333_v21 = vld [vmem:[%s4667_s1 + $0x4] sm:$0xf0]  ;;  %v2504_v22 = vld [vmem:[%s4667_s1 + $0x80] sm:$0xf]  ;;  %v3923_v25 = vld [vmem:[%s4666_s0 + $0x10] sm:$0xff]  ;;  %v108_v28 = vrot.slane %v3898_v16, 1  ;;  %v2641_v37 = vor.u32 %v3383_v15, %v2640_v13 }
  0x21   :  { %754 = vmatpush.bf16.msra.mxu2 %v2593_v58  ;;  %v3349_v23 = vld [vmem:[%s4667_s1 + $0x84] sm:$0xf0]  ;;  %v2568_v24 = vld [vmem:[%s4667_s1 + $0x100] sm:$0xf]  ;;  %v109_v29 = vrot.slane %v3903_v17, 1  ;;  %v111_v30 = vrot.slane %v3923_v25, 1  ;;  %v2441_v40 = vor.u32 %v3333_v21, %v2440_v20 }
  0x22   :  { %782 = vmatpush.bf16.msra.mxu3 %v2657_v62  ;;  %v3365_v27 = vld [vmem:[%s4667_s1 + $0x104] sm:$0xf0]  ;;  %v2632_v31 = vld [vmem:[%s4667_s1 + $0x180] sm:$0xf]  ;;  %v133_v33 = vrot.slane %v3898_v16, 2  ;;  %v134_v34 = vrot.slane %v3903_v17, 2  ;;  %v2505_v41 = vor.u32 %v3349_v23, %v2504_v22 }
  0x23   :  { %699 = vmatpush.bf16.msra.mxu0 %v2457_v5  ;;  %v3381_v32 = vld [vmem:[%s4667_s1 + $0x184] sm:$0xf0]  ;;  %v136_v35 = vrot.slane %v3923_v25, 2  ;;  %v158_v36 = vrot.slane %v3898_v16, 3  ;;  %v159_v38 = vrot.slane %v3903_v17, 3  ;;  %v161_v39 = vrot.slane %v3923_v25, 3 }
  0x24   :  { %727 = vmatpush.bf16.msra.mxu1 %v2521_v9  ;;  %vm157_vm2 = vcmask 1044480   ;;  %v2569_v42 = vor.u32 %v3365_v27, %v2568_v24  ;;  %v110_v43 = vsel %vm107_vm0, %v108_v28, %v109_v29  ;;  %v112_v44 = vsel %vm107_vm0, %v109_v29, %v111_v30  ;;  %v3962_v51 = vld [vmem:[%s4666_s0 + $0x18] sm:$0xff]  ;;  %v3967_v52 = vld [vmem:[%s4666_s0 + $0x20] sm:$0xff]  ;;  %v2752_v59 = vld [vmem:[%s4667_s1 + $0x270] sm:$0xf]  ;;  %s3650_s30 = smov [#allocation7]  }
  0x25   :  { %755 = vmatpush.bf16.msra.mxu2 %v2585_v10  ;;  %v135_v45 = vsel %vm132_vm1, %v133_v33, %v134_v34  ;;  %v137_v46 = vsel %vm132_vm1, %v134_v34, %v136_v35  ;;  %v2633_v47 = vor.u32 %v3381_v32, %v2632_v31  ;;  %v160_v48 = vsel %vm157_vm2, %v158_v36, %v159_v38  ;;  %v3411_v60 = vld [vmem:[%s4667_s1 + $0x274] sm:$0xf0]  ;;  %v3346_v61 = vld [vmem:[%s4667_s1 + $0x74] sm:$0xf]  ;;  %v2498_v62 = vld [vmem:[%s4667_s1 + $0x78] sm:$0xf0] }
  0x26   :  { %783 = vmatpush.bf16.msra.mxu3 %v2649_v14  ;;  %v162_v49 = vsel %vm157_vm2, %v159_v38, %v161_v39  ;;  %v3969_v53 = vpack.c.bf16 %v112_v44, %v110_v43  ;;  %v3971_v54 = vpack.c.bf16 %v137_v46, %v135_v45  ;;  %vm90_vm3 = vcmask 1043456   ;;  %v3362_v1 = vld [vmem:[%s4667_s1 + $0xf4] sm:$0xf]  ;;  %v2562_v2 = vld [vmem:[%s4667_s1 + $0xf8] sm:$0xf0]  ;;  %s2425_s14 = sshll.u32 %s3650_s30, 4  ;;  %s2426_s14 = int_to_ptr.vmem [resolvable:$true] %s2425_s14 }
  0x27   :  { %700 = vmatpush.bf16.msra.mxu0 %v2449_v18  ;;  %v3973_v55 = vpack.c.bf16 %v162_v49, %v160_v48  ;;  %v91_v56 = vrot.slane %v3967_v52, 4  ;;  %v113_v57 = vrot.slane %v3962_v51, 1  ;;  %v120_v58 = vrot.slane %v3967_v52, 5  ;;  %v3378_v6 = vld [vmem:[%s4667_s1 + $0x174] sm:$0xf]  ;;  %v4083_v48 = vld [vmem:[%s4666_s0 + $0x28] sm:$0xff] }
  0x28   :  { %728 = vmatpush.bf16.msra.mxu1 %v2513_v19  ;;  %v138_v63 = vrot.slane %v3962_v51, 2  ;;  %v145_v0 = vrot.slane %v3967_v52, 6  ;;  %v2753_v3 = vor.u32 %v3411_v60, %v2752_v59  ;;  %v2501_v4 = vor.u32 %v3346_v61, %v2498_v62  ;;  %v2626_v7 = vld [vmem:[%s4667_s1 + $0x178] sm:$0xf0]  ;;  %v2744_v8 = vld [vmem:[%s4667_s1 + $0x260] sm:$0xf] }
  0x29   :  { %756 = vmatpush.bf16.msra.mxu2 %v2577_v26  ;;  %v2565_v5 = vor.u32 %v3362_v1, %v2562_v2  ;;  %v163_v9 = vrot.slane %v3962_v51, 3  ;;  %v170_v10 = vrot.slane %v3967_v52, 7  ;;  %v2629_v11 = vor.u32 %v3378_v6, %v2626_v7  ;;  %v3409_v12 = vld [vmem:[%s4667_s1 + $0x264] sm:$0xf0]  ;;  %v3344_v13 = vld [vmem:[%s4667_s1 + $0x64] sm:$0xf] }
  0x2a   :  { %784 = vmatpush.bf16.msra.mxu3 %v2641_v37  ;;  %v2745_v14 = vor.u32 %v3409_v12, %v2744_v8  ;;  %v2490_v15 = vld [vmem:[%s4667_s1 + $0x68] sm:$0xf0]  ;;  %v3360_v18 = vld [vmem:[%s4667_s1 + $0xe4] sm:$0xf]  ;;  %v2736_v23 = vld [vmem:[%s4667_s1 + $0x250] sm:$0xf]  ;;  %v102_v38 = vsel %vm90_vm3, %v3962_v51, %v91_v56  ;;  %v114_v44 = vsel %vm107_vm0, %v111_v30, %v113_v57  ;;  %v131_v45 = vsel %vm90_vm3, %v113_v57, %v120_v58 }
  0x2b   :  { %701 = vmatpush.bf16.msra.mxu0 %v2441_v40  ;;  %v2554_v19 = vld [vmem:[%s4667_s1 + $0xe8] sm:$0xf0]  ;;  %v2493_v20 = vor.u32 %v3344_v13, %v2490_v15  ;;  %v3376_v21 = vld [vmem:[%s4667_s1 + $0x164] sm:$0xf]  ;;  %v3407_v27 = vld [vmem:[%s4667_s1 + $0x254] sm:$0xf0]  ;;  %v139_v46 = vsel %vm132_vm1, %v136_v35, %v138_v63  ;;  %v164_v49 = vsel %vm157_vm2, %v161_v39, %v163_v9  ;;  %v181_v35 = vsel %vm90_vm3, %v163_v9, %v170_v10 }
  0x2c   :  { %729 = vmatpush.bf16.msra.mxu1 %v2505_v41  ;;  %v2618_v22 = vld [vmem:[%s4667_s1 + $0x168] sm:$0xf0]  ;;  %v2557_v24 = vor.u32 %v3360_v18, %v2554_v19  ;;  %v3342_v28 = vld [vmem:[%s4667_s1 + $0x54] sm:$0xf]  ;;  %v2482_v29 = vld [vmem:[%s4667_s1 + $0x58] sm:$0xf0]  ;;  %v2737_v34 = vor.u32 %v3407_v27, %v2736_v23  ;;  %v4106_v61 = vpack.c.bf16 %v102_v38, %v3923_v25  ;;  %v4117_v2 = vpack.c.bf16 %v131_v45, %v114_v44 }
  0x2d   :  { %757 = vmatpush.bf16.msra.mxu2 %v2569_v42  ;;  %v2621_v26 = vor.u32 %v3376_v21, %v2618_v22  ;;  %v3358_v31 = vld [vmem:[%s4667_s1 + $0xd4] sm:$0xf]  ;;  %v2546_v32 = vld [vmem:[%s4667_s1 + $0xd8] sm:$0xf0]  ;;  %v2485_v36 = vor.u32 %v3342_v28, %v2482_v29  ;;  %v3340_v42 = vld [vmem:[%s4667_s1 + $0x44] sm:$0xf] }
  0x2e   :  { %785 = vmatpush.bf16.msra.mxu3 %v2633_v47  ;;  %702 = vmatmul.bf16.vlgmr.msra.gmra.mxu0 %v3957_v50  ;;  %v3374_v33 = vld [vmem:[%s4667_s1 + $0x154] sm:$0xf]  ;;  %v2610_v37 = vld [vmem:[%s4667_s1 + $0x158] sm:$0xf0]  ;;  %v2549_v40 = vor.u32 %v3358_v31, %v2546_v32  ;;  %v2474_v43 = vld [vmem:[%s4667_s1 + $0x48] sm:$0xf0]  ;;  %v156_v47 = vsel %vm90_vm3, %v138_v63, %v145_v0 }
  0x2f   :  { %730 = vmatmul.bf16.vlgmr.msra.gmra.mxu1 %v3969_v53  ;;  %806 = vmatpush.bf16.msrb.mxu0 %v2753_v3  ;;  %v2613_v41 = vor.u32 %v3374_v33, %v2610_v37  ;;  %v4088_v30 = vld [vmem:[%s4666_s0 + $0x30] sm:$0xff]  ;;  %v2728_v57 = vld [vmem:[%s4667_s1 + $0x240] sm:$0xf]  ;;  %v3405_v59 = vld [vmem:[%s4667_s1 + $0x244] sm:$0xf0]  ;;  %v2477_v39 = vor.u32 %v3340_v42, %v2474_v43  ;;  %v4119_v3 = vpack.c.bf16 %v156_v47, %v139_v46  ;;  %vm119_vm4 = vcmask 1042432  }
  0x30   :  { %758 = vmatmul.bf16.vlgmr.msra.gmra.mxu2 %v3971_v54  ;;  %834 = vmatpush.bf16.msrb.mxu1 %v2501_v4  ;;  %v3356_v60 = vld [vmem:[%s4667_s1 + $0xc4] sm:$0xf]  ;;  %v2538_v62 = vld [vmem:[%s4667_s1 + $0xc8] sm:$0xf0]  ;;  %v4121_v4 = vpack.c.bf16 %v181_v35, %v164_v49  ;;  %v94_v6 = vrot.slane %v4088_v30, 4  ;;  %v2729_v7 = vor.u32 %v3405_v59, %v2728_v57  ;;  %v121_v19 = vrot.slane %v4083_v48, 5 }
  0x31   :  { %786 = vmatmul.bf16.vlgmr.msra.gmra.mxu3 %v3973_v55  ;;  %862 = vmatpush.bf16.msrb.mxu2 %v2565_v5  ;;  %v3372_v63 = vld [vmem:[%s4667_s1 + $0x144] sm:$0xf]  ;;  %v2602_v1 = vld [vmem:[%s4667_s1 + $0x148] sm:$0xf0]  ;;  %v92_v5 = vrot.slane %v4083_v48, 4  ;;  %v2541_v8 = vor.u32 %v3356_v60, %v2538_v62  ;;  %v123_v23 = vrot.slane %v4088_v30, 5 }
  0x32   :  { %890 = vmatpush.bf16.msrb.mxu3 %v2629_v11  ;;  %v2605_v9 = vor.u32 %v3372_v63, %v2602_v1  ;;  %v2720_v11 = vld [vmem:[%s4667_s1 + $0x230] sm:$0xf]  ;;  %v3403_v12 = vld [vmem:[%s4667_s1 + $0x234] sm:$0xf0]  ;;  %v3338_v13 = vld [vmem:[%s4667_s1 + $0x34] sm:$0xf] }
  0x33   :  { %807 = vmatpush.bf16.msrb.mxu0 %v2745_v14  ;;  %v2466_v14 = vld [vmem:[%s4667_s1 + $0x38] sm:$0xf0]  ;;  %v3354_v15 = vld [vmem:[%s4667_s1 + $0xb4] sm:$0xf]  ;;  %vm144_vm5 = vcmask 1041408   ;;  %vm169_vm6 = vcmask 1040384   ;;  %v93_v1 = vsel %vm90_vm3, %v91_v56, %v92_v5 }
  0x34   :  { %835 = vmatpush.bf16.msrb.mxu1 %v2493_v20  ;;  %v2530_v18 = vld [vmem:[%s4667_s1 + $0xb8] sm:$0xf0]  ;;  %v2469_v20 = vor.u32 %v3338_v13, %v2466_v14  ;;  %v3370_v21 = vld [vmem:[%s4667_s1 + $0x134] sm:$0xf]  ;;  %v3336_v27 = vld [vmem:[%s4667_s1 + $0x24] sm:$0xf] }
  0x35   :  { %863 = vmatpush.bf16.msrb.mxu2 %v2557_v24  ;;  %v2594_v22 = vld [vmem:[%s4667_s1 + $0x138] sm:$0xf0]  ;;  %v2721_v24 = vor.u32 %v3403_v12, %v2720_v11  ;;  %v2533_v28 = vor.u32 %v3354_v15, %v2530_v18  ;;  %v3401_v31 = vld [vmem:[%s4667_s1 + $0x224] sm:$0xf0]  ;;  %v2458_v32 = vld [vmem:[%s4667_s1 + $0x28] sm:$0xf0] }
  0x36   :  { %891 = vmatpush.bf16.msrb.mxu3 %v2621_v26  ;;  %v2712_v26 = vld [vmem:[%s4667_s1 + $0x220] sm:$0xf]  ;;  %v2597_v29 = vor.u32 %v3370_v21, %v2594_v22  ;;  %v3352_v33 = vld [vmem:[%s4667_s1 + $0xa4] sm:$0xf]  ;;  %v2586_v38 = vld [vmem:[%s4667_s1 + $0x128] sm:$0xf0] }
  0x37   :  { %808 = vmatpush.bf16.msrb.mxu0 %v2737_v34  ;;  %v2461_v34 = vor.u32 %v3336_v27, %v2458_v32  ;;  %v3368_v37 = vld [vmem:[%s4667_s1 + $0x124] sm:$0xf]  ;;  %v3334_v42 = vld [vmem:[%s4667_s1 + $0x14] sm:$0xf]  ;;  %v2450_v43 = vld [vmem:[%s4667_s1 + $0x18] sm:$0xf0]  ;;  %v2713_v46 = vor.u32 %v3401_v31, %v2712_v26 }
  0x38   :  { %836 = vmatpush.bf16.msrb.mxu1 %v2485_v36  ;;  %v2522_v36 = vld [vmem:[%s4667_s1 + $0xa8] sm:$0xf0]  ;;  %v171_v44 = vrot.slane %v4083_v48, 7  ;;  %v173_v45 = vrot.slane %v4088_v30, 7  ;;  %v2589_v49 = vor.u32 %v3368_v37, %v2586_v38  ;;  %v2704_v35 = vld [vmem:[%s4667_s1 + $0x210] sm:$0xf]  ;;  %v2453_v60 = vor.u32 %v3334_v42, %v2450_v43 }
  0x39   :  { %864 = vmatpush.bf16.msrb.mxu2 %v2549_v40  ;;  %v146_v40 = vrot.slane %v4083_v48, 6  ;;  %v2525_v47 = vor.u32 %v3352_v33, %v2522_v36  ;;  %v3399_v57 = vld [vmem:[%s4667_s1 + $0x214] sm:$0xf0]  ;;  %v3350_v59 = vld [vmem:[%s4667_s1 + $0x94] sm:$0xf]  ;;  %vm1013_vm7 = vcmask 457728  }
  0x3a   :  { %892 = vmatpush.bf16.msrb.mxu3 %v2613_v41  ;;  %v148_v41 = vrot.slane %v4088_v30, 6  ;;  %v3366_v62 = vld [vmem:[%s4667_s1 + $0x114] sm:$0xf]  ;;  %v2578_v63 = vld [vmem:[%s4667_s1 + $0x118] sm:$0xf0]  ;;  %v172_v12 = vsel %vm169_vm6, %v170_v10, %v171_v44  ;;  %v2705_v13 = vor.u32 %v3399_v57, %v2704_v35  ;;  %v174_v14 = vsel %vm169_vm6, %v171_v44, %v173_v45 }
  0x3b   :  { %809 = vmatpush.bf16.msrb.mxu0 %v2729_v7  ;;  %v95_v7 = vsel %vm90_vm3, %v92_v5, %v94_v6  ;;  %v3332_v11 = vld [vmem:[%s4667_s1 + $0x4] sm:$0xf]  ;;  %v2442_v56 = vld [vmem:[%s4667_s1 + $0x8] sm:$0xf0]  ;;  %v147_v5 = vsel %vm144_vm5, %v145_v0, %v146_v40  ;;  %v2581_v18 = vor.u32 %v3366_v62, %v2578_v63  ;;  %v2696_v0 = vld [vmem:[%s4667_s1 + $0x200] sm:$0xf] }
  0x3c   :  { %837 = vmatpush.bf16.msrb.mxu1 %v2477_v39  ;;  %v2514_v39 = vld [vmem:[%s4667_s1 + $0x98] sm:$0xf0]  ;;  %v3348_v10 = vld [vmem:[%s4667_s1 + $0x84] sm:$0xf]  ;;  %v2445_v21 = vor.u32 %v3332_v11, %v2442_v56  ;;  %v2506_v22 = vld [vmem:[%s4667_s1 + $0x88] sm:$0xf0] }
  0x3d   :  { %865 = vmatpush.bf16.msrb.mxu2 %v2541_v8  ;;  %v122_v8 = vsel %vm119_vm4, %v120_v58, %v121_v19  ;;  %v149_v58 = vsel %vm144_vm5, %v146_v40, %v148_v41  ;;  %v2517_v15 = vor.u32 %v3350_v59, %v2514_v39  ;;  %v2570_v26 = vld [vmem:[%s4667_s1 + $0x108] sm:$0xf0]  ;;  %v2509_v32 = vor.u32 %v3348_v10, %v2506_v22  ;;  %v3394_v62 = vld [vmem:[%s4667_s1 + $0x1f4] sm:$0xf]  ;;  %v3392_v63 = vld [vmem:[%s4667_s1 + $0x1e4] sm:$0xf] }
  0x3e   :  { %707 = vmatmul.bf16.gmra.mxu0 %v4106_v61  ;;  %893 = vmatpush.bf16.msrb.mxu3 %v2605_v9  ;;  %v124_v9 = vsel %vm119_vm4, %v121_v19, %v123_v23  ;;  %v3397_v19 = vld [vmem:[%s4667_s1 + $0x204] sm:$0xf0]  ;;  %v3406_v11 = vld [vmem:[%s4667_s1 + $0x254] sm:$0xf]  ;;  %v2738_v56 = vld [vmem:[%s4667_s1 + $0x258] sm:$0xf0] }
  0x3f   :  { %735 = vmatmul.bf16.gmra.mxu1 %v4117_v2  ;;  %810 = vmatpush.bf16.msrb.mxu0 %v2721_v24  ;;  %v3364_v24 = vld [vmem:[%s4667_s1 + $0x104] sm:$0xf]  ;;  %v4257_v27 = vpack.c.bf16 %v124_v9, %v122_v8  ;;  %v2697_v31 = vor.u32 %v3397_v19, %v2696_v0  ;;  %v2674_v8 = vld [vmem:[%s4667_s1 + $0x1d8] sm:$0xf0]  ;;  %v3386_v22 = vld [vmem:[%s4667_s1 + $0x1b4] sm:$0xf] }
  0x40   :  { %763 = vmatmul.bf16.gmra.mxu2 %v4119_v3  ;;  %838 = vmatpush.bf16.msrb.mxu1 %v2469_v20  ;;  %v4246_v20 = vpack.c.bf16 %v95_v7, %v93_v1  ;;  %v2573_v33 = vor.u32 %v3364_v24, %v2570_v26  ;;  %v2682_v1 = vld [vmem:[%s4667_s1 + $0x1e8] sm:$0xf0]  ;;  %v3408_v7 = vld [vmem:[%s4667_s1 + $0x264] sm:$0xf]  ;;  %v2658_v24 = vld [vmem:[%s4667_s1 + $0x1b8] sm:$0xf0] }
  0x41   :  { %791 = vmatmul.bf16.gmra.mxu3 %v4121_v4  ;;  %866 = vmatpush.bf16.msrb.mxu2 %v2533_v28  ;;  %v4259_v28 = vpack.c.bf16 %v149_v58, %v147_v5  ;;  %v187_v5 = vrot.slane %v3962_v51, 4  ;;  %v2730_v51 = vld [vmem:[%s4667_s1 + $0x248] sm:$0xf0]  ;;  %v2661_v26 = vor.u32 %v3386_v22, %v2658_v24  ;;  %vm1813_vm8 = vcmask 162816  }
  0x42   :  { %894 = vmatpush.bf16.msrb.mxu3 %v2597_v29  ;;  %v4261_v29 = vpack.c.bf16 %v174_v14, %v172_v12  ;;  %v2741_v12 = vor.u32 %v3406_v11, %v2738_v56  ;;  %v2666_v14 = vld [vmem:[%s4667_s1 + $0x1c8] sm:$0xf0] }
  0x43   :  { %811 = vmatpush.bf16.msrb.mxu0 %v2713_v46  ;;  %v193_v0 = vsel %vm90_vm3, %v187_v5, %v3967_v52  ;;  %v3402_v52 = vld [vmem:[%s4667_s1 + $0x234] sm:$0xf] }
  0x44   :  { %839 = vmatpush.bf16.msrb.mxu1 %v2461_v34  ;;  %v4270_v34 = vld [vmem:[%s4666_s0 + $0x38] sm:$0xff] }
  0x45   :  { %867 = vmatpush.bf16.msrb.mxu2 %v2525_v47  ;;  %v96_v36 = vrot.slane %v4270_v34, 4  ;;  %v125_v37 = vrot.slane %v4270_v34, 5  ;;  %v150_v38 = vrot.slane %v4270_v34, 6  ;;  %v175_v40 = vrot.slane %v4270_v34, 7 }
  0x46   :  { %895 = vmatpush.bf16.msrb.mxu3 %v2589_v49 }
  0x47   :  { %812 = vmatpush.bf16.msrb.mxu0 %v2705_v13  ;;  %v97_v42 = vsel %vm90_vm3, %v94_v6, %v96_v36  ;;  %v126_v43 = vsel %vm119_vm4, %v123_v23, %v125_v37  ;;  %v151_v44 = vsel %vm144_vm5, %v148_v41, %v150_v38  ;;  %v176_v46 = vsel %vm169_vm6, %v173_v45, %v175_v40  ;;  %v3388_v13 = vld [vmem:[%s4667_s1 + $0x1c4] sm:$0xf]  ;;  %v2650_v36 = vld [vmem:[%s4667_s1 + $0x1a8] sm:$0xf0]  ;;  %v2642_v38 = vld [vmem:[%s4667_s1 + $0x198] sm:$0xf0] }
  0x48   :  { %840 = vmatpush.bf16.msrb.mxu1 %v2453_v60  ;;  %v4288_v47 = vpack.c.bf16 %v97_v42, %v97_v42  ;;  %v4290_v49 = vpack.c.bf16 %v126_v43, %v126_v43  ;;  %v4292_v35 = vpack.c.bf16 %v151_v44, %v151_v44  ;;  %v4294_v57 = vpack.c.bf16 %v176_v46, %v176_v46  ;;  %v3400_v37 = vld [vmem:[%s4667_s1 + $0x224] sm:$0xf]  ;;  %v3398_v42 = vld [vmem:[%s4667_s1 + $0x214] sm:$0xf]  ;;  %v2706_v43 = vld [vmem:[%s4667_s1 + $0x218] sm:$0xf0] }
  0x49   :  { %868 = vmatpush.bf16.msrb.mxu2 %v2517_v15  ;;  %v4302_v6 = vpack.c.bf16 %v4088_v30, %v4083_v48  ;;  %v182_v23 = vrot.slane %v3898_v16, 4  ;;  %v183_v41 = vrot.slane %v3903_v17, 4  ;;  %v185_v45 = vrot.slane %v3923_v25, 4  ;;  %v2690_v48 = vld [vmem:[%s4667_s1 + $0x1f8] sm:$0xf0] }
  0x4a   :  { %896 = vmatpush.bf16.msrb.mxu3 %v2581_v18  ;;  %v3410_v16 = vld [vmem:[%s4667_s1 + $0x274] sm:$0xf]  ;;  %v2693_v17 = vor.u32 %v3394_v62, %v2690_v48  ;;  %v2754_v25 = vld [vmem:[%s4667_s1 + $0x278] sm:$0xf0]  ;;  %v3404_v15 = vld [vmem:[%s4667_s1 + $0x244] sm:$0xf]  ;;  %v2669_v19 = vor.u32 %v3388_v13, %v2666_v14  ;;  %v2709_v46 = vor.u32 %v3398_v42, %v2706_v43  ;;  %v213_v48 = vpack.c.bf16 %v4270_v34, %v4270_v34 }
  0x4b   :  { %813 = vmatpush.bf16.msrb.mxu0 %v2697_v31  ;;  %v184_v59 = vsel %vm90_vm3, %v182_v23, %v183_v41  ;;  %v186_v60 = vsel %vm90_vm3, %v183_v41, %v185_v45  ;;  %v2757_v30 = vor.u32 %v3410_v16, %v2754_v25  ;;  %v188_v18 = vsel %vm90_vm3, %v185_v45, %v187_v5  ;;  %v2722_v31 = vld [vmem:[%s4667_s1 + $0x238] sm:$0xf0]  ;;  %v3380_v23 = vld [vmem:[%s4667_s1 + $0x184] sm:$0xf]  ;;  %v2634_v41 = vld [vmem:[%s4667_s1 + $0x188] sm:$0xf0] }
  0x4c   :  { %841 = vmatpush.bf16.msrb.mxu1 %v2445_v21  ;;  %v4309_v39 = vpack.c.bf16 %v186_v60, %v184_v59  ;;  %v2733_v10 = vor.u32 %v3404_v15, %v2730_v51  ;;  %v4367_v21 = vpack.c.bf16 %v193_v0, %v188_v18  ;;  %v3396_v45 = vld [vmem:[%s4667_s1 + $0x204] sm:$0xf]  ;;  %v2637_v59 = vor.u32 %v3380_v23, %v2634_v41  ;;  %v2698_v60 = vld [vmem:[%s4667_s1 + $0x208] sm:$0xf0] }
  0x4d   :  { %869 = vmatpush.bf16.msrb.mxu2 %v2509_v32  ;;  %v2725_v32 = vor.u32 %v3402_v52, %v2722_v31  ;;  %v2701_v62 = vor.u32 %v3396_v45, %v2698_v60 }
  0x4e   :  { %712 = vmatmul.bf16.gmra.mxu0 %v4246_v20  ;;  %897 = vmatpush.bf16.msrb.mxu3 %v2573_v33  ;;  %v3384_v33 = vld [vmem:[%s4667_s1 + $0x1a4] sm:$0xf] }
  0x4f   :  { %740 = vmatmul.bf16.gmra.mxu1 %v4257_v27  ;;  %918 = vmatpush.bf16.msra.mxu0 %v2693_v17 }
  0x50   :  { %768 = vmatmul.bf16.gmra.mxu2 %v4259_v28  ;;  %946 = vmatpush.bf16.msra.mxu1 %v2757_v30 }
  0x51   :  { %796 = vmatmul.bf16.gmra.mxu3 %v4261_v29 }
  0x5e   :  { %717 = vmatmul.bf16.gmra.mxu0 %v4288_v47 }
  0x5f   :  { %745 = vmatmul.bf16.gmra.mxu1 %v4290_v49 }
  0x60   :  { %773 = vmatmul.bf16.gmra.mxu2 %v4292_v35 }
  0x61   :  { %801 = vmatmul.bf16.gmra.mxu3 %v4294_v57 }
  0x6e   :  { %814 = vmatmul.bf16.vlgmr.msrb.gmra.mxu0 %v4309_v39 }
  0x6f   :  { %842 = vmatmul.bf16.vlgmr.msrb.gmra.mxu1 %v3957_v50  ;;  %v2685_v50 = vor.u32 %v3392_v63, %v2682_v1 }
  0x70   :  { %870 = vmatmul.bf16.vlgmr.msrb.gmra.mxu2 %v3969_v53  ;;  %v2746_v53 = vld [vmem:[%s4667_s1 + $0x268] sm:$0xf0] }
  0x71   :  { %898 = vmatmul.bf16.vlgmr.msrb.gmra.mxu3 %v3971_v54  ;;  %v3390_v54 = vld [vmem:[%s4667_s1 + $0x1d4] sm:$0xf]  ;;  %v2749_v9 = vor.u32 %v3408_v7, %v2746_v53  ;;  %919 = vmatpush.bf16.msra.mxu0 %v2685_v50 }
  0x72   :  { %v2677_v58 = vor.u32 %v3390_v54, %v2674_v8 }
  0x73   :  { %947 = vmatpush.bf16.msra.mxu1 %v2749_v9 }
  0x75   :  { %920 = vmatpush.bf16.msra.mxu0 %v2677_v58 }
  0x77   :  { %948 = vmatpush.bf16.msra.mxu1 %v2741_v12 }
  0x79   :  { %921 = vmatpush.bf16.msra.mxu0 %v2669_v19 }
  0x7b   :  { %949 = vmatpush.bf16.msra.mxu1 %v2733_v10 }
  0x7d   :  { %922 = vmatpush.bf16.msra.mxu0 %v2661_v26 }
  0x7e   :  { %819 = vmatmul.bf16.gmra.mxu0 %v4367_v21 }
  0x7f   :  { %847 = vmatmul.bf16.gmra.mxu1 %v4106_v61  ;;  %v2653_v61 = vor.u32 %v3384_v33, %v2650_v36 }
  0x80   :  { %875 = vmatmul.bf16.gmra.mxu2 %v4117_v2  ;;  %950 = vmatpush.bf16.msra.mxu1 %v2725_v32  ;;  %v2714_v2 = vld [vmem:[%s4667_s1 + $0x228] sm:$0xf0] }
  0x81   :  { %903 = vmatmul.bf16.gmra.mxu3 %v4119_v3  ;;  %v3382_v3 = vld [vmem:[%s4667_s1 + $0x194] sm:$0xf]  ;;  %v2717_v40 = vor.u32 %v3400_v37, %v2714_v2  ;;  %923 = vmatpush.bf16.msra.mxu0 %v2653_v61 }
  0x82   :  { %v2645_v44 = vor.u32 %v3382_v3, %v2642_v38 }
  0x84   :  { %951 = vmatpush.bf16.msra.mxu1 %v2717_v40 }
  0x85   :  { %924 = vmatpush.bf16.msra.mxu0 %v2645_v44 }
  0x88   :  { %952 = vmatpush.bf16.msra.mxu1 %v2709_v46 }
  0x89   :  { %925 = vmatpush.bf16.msra.mxu0 %v2637_v59 }
  0x8c   :  { %953 = vmatpush.bf16.msra.mxu1 %v2701_v62 }
  0x8e   :  { %824 = vmatmul.bf16.gmra.mxu0 %v4302_v6 }
  0x8f   :  { %852 = vmatmul.bf16.gmra.mxu1 %v4246_v20 }
  0x90   :  { %880 = vmatmul.bf16.gmra.mxu2 %v4257_v27 }
  0x91   :  { %908 = vmatmul.bf16.gmra.mxu3 %v4259_v28 }
  0x9e   :  { %829 = vmatmul.bf16.gmra.mxu0 %v213_v48 }
  0x9f   :  { %857 = vmatmul.bf16.gmra.mxu1 %v4288_v47 }
  0xa0   :  { %885 = vmatmul.bf16.gmra.mxu2 %v4290_v49 }
  0xa1   :  { %913 = vmatmul.bf16.gmra.mxu3 %v4292_v35 }
  0xab   :  { %v703_v16 = vpop.f32.mrf.mxu0 }
  0xac   :  { %v731_v17 = vpop.f32.mrf.mxu1 }
  0xad   :  { %v732_v25 = vadd.f32 %v731_v17, %v703_v16 }
  0xae   :  { %926 = vmatmul.bf16.vlgmr.msra.gmra.mxu0 %v3973_v55 }
  0xaf   :  { %954 = vmatmul.bf16.vlgmr.msra.gmra.mxu1 %v4309_v39 }
  0xb3   :  { %v759_v20 = vpop.f32.mrf.mxu2  ;;  %v4432_v28 = vpop.f32.mrf.mxu0 }
  0xb4   :  { %v760_v27 = vadd.f32 %v759_v20, %v732_v25  ;;  %v787_v30 = vpop.f32.mrf.mxu3  ;;  %v4434_v34 = vpop.f32.mrf.mxu1 }
  0xb6   :  { %v788_v63 = vadd.f32 %v787_v30, %v760_v27 }
  0xbb   :  { %v4436_v47 = vpop.f32.mrf.mxu2  ;;  %v708_v49 = vpop.f32.mrf.mxu0 }
  0xbc   :  { %v4438_v1 = vpop.f32.mrf.mxu3  ;;  %v736_v35 = vpop.f32.mrf.mxu1 }
  0xbd   :  { %v737_v7 = vadd.f32 %v736_v35, %v708_v49 }
  0xbe   :  { %931 = vmatmul.bf16.gmra.mxu0 %v4121_v4 }
  0xbf   :  { %959 = vmatmul.bf16.gmra.mxu1 %v4367_v21 }
  0xc3   :  { %v764_v55 = vpop.f32.mrf.mxu2  ;;  %v4442_v50 = vpop.f32.mrf.mxu0 }
  0xc4   :  { %v765_v39 = vadd.f32 %v764_v55, %v737_v7  ;;  %v792_v53 = vpop.f32.mrf.mxu3  ;;  %v4444_v54 = vpop.f32.mrf.mxu1 }
  0xc6   :  { %v793_v8 = vadd.f32 %v792_v53, %v765_v39 }
  0xcb   :  { %v4446_v9 = vpop.f32.mrf.mxu2  ;;  %v713_v11 = vpop.f32.mrf.mxu0 }
  0xcc   :  { %v4448_v56 = vpop.f32.mrf.mxu3  ;;  %v741_v5 = vpop.f32.mrf.mxu1 }
  0xcd   :  { %v742_v58 = vadd.f32 %v741_v5, %v713_v11 }
  0xce   :  { %936 = vmatmul.bf16.gmra.mxu0 %v4261_v29 }
  0xcf   :  { %964 = vmatmul.bf16.gmra.mxu1 %v4302_v6 }
  0xd3   :  { %v769_v4 = vpop.f32.mrf.mxu2  ;;  %v4452_v13 = vpop.f32.mrf.mxu0 }
  0xd4   :  { %v770_v12 = vadd.f32 %v769_v4, %v742_v58  ;;  %v797_v14 = vpop.f32.mrf.mxu3  ;;  %v4454_v15 = vpop.f32.mrf.mxu1 }
  0xd6   :  { %v798_v51 = vadd.f32 %v797_v14, %v770_v12 }
  0xdb   :  { %v4456_v18 = vpop.f32.mrf.mxu2  ;;  %v718_v0 = vpop.f32.mrf.mxu0 }
  0xdc   :  { %v4458_v19 = vpop.f32.mrf.mxu3  ;;  %v746_v10 = vpop.f32.mrf.mxu1 }
  0xdd   :  { %v747_v21 = vadd.f32 %v746_v10, %v718_v0 }
  0xde   :  { %941 = vmatmul.bf16.gmra.mxu0 %v4294_v57 }
  0xdf   :  { %969 = vmatmul.bf16.gmra.mxu1 %v213_v48 }
  0xe3   :  { %v774_v29 = vpop.f32.mrf.mxu2  ;;  %v720_v22 = vpop.f32.mrf.mxu0 }
  0xe4   :  { %v775_v6 = vadd.f32 %v774_v29, %v747_v21  ;;  %v802_v24 = vpop.f32.mrf.mxu3  ;;  %v748_v52 = vpop.f32.mrf.mxu1 }
  0xe6   :  { %v803_v26 = vadd.f32 %v802_v24, %v775_v6 }
  0xeb   :  { %v776_v31 = vpop.f32.mrf.mxu2  ;;  %v815_v33 = vpop.f32.mrf.mxu0 }
  0xec   :  { %v804_v32 = vpop.f32.mrf.mxu3  ;;  %v4461_v36 = vadd.f32 %v815_v33, %v788_v63  ;;  %v843_v37 = vpop.f32.mrf.mxu1 }
  0xf3   :  { %v871_v61 = vpop.f32.mrf.mxu2  ;;  %v4463_v3 = vpop.f32.mrf.mxu0 }
  0xf4   :  { %v872_v2 = vadd.f32 %v871_v61, %v843_v37  ;;  %v899_v38 = vpop.f32.mrf.mxu3  ;;  %v4465_v40 = vpop.f32.mrf.mxu1 }
  0xf6   :  { %v900_v57 = vadd.f32 %v899_v38, %v872_v2 }
  0xfb   :  { %v4467_v42 = vpop.f32.mrf.mxu2  ;;  %v820_v43 = vpop.f32.mrf.mxu0 }
  0xfc   :  { %v4469_v44 = vpop.f32.mrf.mxu3  ;;  %v4471_v46 = vadd.f32 %v820_v43, %v793_v8  ;;  %v848_v23 = vpop.f32.mrf.mxu1 }
 0x103   :  { %v876_v41 = vpop.f32.mrf.mxu2  ;;  %v4473_v59 = vpop.f32.mrf.mxu0 }
 0x104   :  { %v877_v45 = vadd.f32 %v876_v41, %v848_v23  ;;  %v904_v60 = vpop.f32.mrf.mxu3  ;;  %v850_v62 = vpop.f32.mrf.mxu1 }
 0x106   :  { %v905_v48 = vadd.f32 %v904_v60, %v877_v45 }
 0x10b   :  { %v878_v16 = vpop.f32.mrf.mxu2  ;;  %v825_v17 = vpop.f32.mrf.mxu0 }
 0x10c   :  { %v906_v25 = vpop.f32.mrf.mxu3  ;;  %v826_v20 = vadd.f32 %v825_v17, %v798_v51  ;;  %v853_v27 = vpop.f32.mrf.mxu1 }
 0x113   :  { %v881_v30 = vpop.f32.mrf.mxu2  ;;  %v827_v49 = vpop.f32.mrf.mxu0 }
 0x114   :  { %v882_v63 = vadd.f32 %v881_v30, %v853_v27  ;;  %v909_v35 = vpop.f32.mrf.mxu3  ;;  %v855_v7 = vpop.f32.mrf.mxu1 }
 0x116   :  { %v910_v55 = vadd.f32 %v909_v35, %v882_v63 }
 0x11b   :  { %v883_v39 = vpop.f32.mrf.mxu2  ;;  %v830_v8 = vpop.f32.mrf.mxu0 }
 0x11c   :  { %v884_v53 = vadd.f32 %v883_v39, %v855_v7  ;;  %v911_v11 = vpop.f32.mrf.mxu3  ;;  %v831_v5 = vadd.f32 %v830_v8, %v803_v26  ;;  %v858_v58 = vpop.f32.mrf.mxu1 }
 0x11e   :  { %v912_v4 = vadd.f32 %v911_v11, %v884_v53  ;;  %v879_v53 = vadd.f32 %v878_v16, %v850_v62  ;;  %v734_v62 = vadd.f32 %v4434_v34, %v4432_v28 }
 0x123   :  { %v886_v12 = vpop.f32.mrf.mxu2  ;;  %v832_v14 = vpop.f32.mrf.mxu0 }
 0x124   :  { %v914_v0 = vpop.f32.mrf.mxu3  ;;  %v860_v10 = vpop.f32.mrf.mxu1  ;;  %v887_v7 = vadd.f32 %v886_v12, %v858_v58  ;;  %v762_v12 = vadd.f32 %v4436_v47, %v734_v62  ;;  %v3004_v62 = vld [vmem:[#allocation2 + $0x1c0] sm:$0xf] }
 0x126   :  { %v915_v8 = vadd.f32 %v914_v0, %v887_v7  ;;  %v3491_v7 = vld [vmem:[#allocation2 + $0x254] sm:$0xf0] }
 0x12b   :  { %v888_v21 = vpop.f32.mrf.mxu2  ;;  %v927_v51 = vpop.f32.mrf.mxu0 }
 0x12c   :  { %v916_v29 = vpop.f32.mrf.mxu3  ;;  %v928_v6 = vadd.f32 %v927_v51, %v900_v57  ;;  %v955_v22 = vpop.f32.mrf.mxu1  ;;  %v744_v57 = vadd.f32 %v4454_v15, %v4452_v13  ;;  %v739_v13 = vadd.f32 %v4444_v54, %v4442_v50  ;;  %v874_v15 = vadd.f32 %v4467_v42, %v4465_v40  ;;  %v3412_v51 = vld [vmem:[%s4669_s3] sm:$0xff] }
 0x12d   :  { %v3092_v29 = vld [vmem:[#allocation2 + $0x270] sm:$0xf] }
 0x12e   :  { %v956_v24 = vadd.f32 %v955_v22, %v928_v6  ;;  %v772_v17 = vadd.f32 %v4456_v18, %v744_v57  ;;  %v907_v18 = vadd.f32 %v906_v25, %v879_v53  ;;  %v902_v16 = vadd.f32 %v4469_v44, %v874_v15  ;;  %v3495_v6 = vld [vmem:[#allocation2 + $0x274] sm:$0xf0]  ;;  %v2964_v22 = vld [vmem:[#allocation2 + $0x170] sm:$0xf]  ;;  %v3020_v57 = vld [vmem:[#allocation2 + $0x1e0] sm:$0xf] }
 0x12f   :  { %v790_v25 = vadd.f32 %v4438_v1, %v762_v12  ;;  %v3413_v1 = vld [vmem:[%s4669_s3 + $0x8] sm:$0xff]  ;;  %v3459_v53 = vld [vmem:[#allocation2 + $0x154] sm:$0xf0] }
 0x130   :  { %v974_v52 = vmax.f32 %v4461_v36, %v956_v24  ;;  %v800_v30 = vadd.f32 %v4458_v19, %v772_v17  ;;  %v3093_v24 = vor.u32 %v3495_v6, %v3092_v29  ;;  %v3473_v12 = vld [vmem:[#allocation2 + $0x1c4] sm:$0xf0]  ;;  %v2924_v6 = vld [vmem:[#allocation2 + $0x120] sm:$0xf] }
 0x131   :  { %v818_v34 = vadd.f32 %v4463_v3, %v790_v25  ;;  %v3414_v3 = vld [vmem:[%s4669_s3 + $0x10] sm:$0xff] }
 0x132   :  { %v828_v35 = vadd.f32 %v827_v49, %v800_v30  ;;  %v3429_v30 = vld [vmem:[#allocation2 + $0x64] sm:$0xf0]  ;;  %v2932_v25 = vld [vmem:[#allocation2 + $0x130] sm:$0xf] }
 0x133   :  { %v929_v31 = vpop.f32.mrf.mxu0 }
 0x134   :  { %v957_v32 = vpop.f32.mrf.mxu1  ;;  %v930_v50 = vadd.f32 %v929_v31, %v902_v16  ;;  %v3028_v31 = vld [vmem:[#allocation2 + $0x1f0] sm:$0xf] }
 0x13b   :  { %v932_v33 = vpop.f32.mrf.mxu0 }
 0x13c   :  { %v933_v37 = vadd.f32 %v932_v33, %v905_v48  ;;  %v960_v61 = vpop.f32.mrf.mxu1 }
 0x13e   :  { %v961_v26 = vadd.f32 %v960_v61, %v933_v37  ;;  %v2836_v61 = vld [vmem:[#allocation2 + $0x70] sm:$0xf] }
 0x140   :  { %v976_v2 = vmax.f32 %v4471_v46, %v961_v26  ;;  %v3431_v26 = vld [vmem:[#allocation2 + $0x74] sm:$0xf0] }
 0x143   :  { %v934_v38 = vpop.f32.mrf.mxu0 }
 0x144   :  { %v962_v43 = vpop.f32.mrf.mxu1  ;;  %v935_v49 = vadd.f32 %v934_v38, %v907_v18  ;;  %v2837_v38 = vor.u32 %v3431_v26, %v2836_v61  ;;  %v3068_v18 = vld [vmem:[#allocation2 + $0x240] sm:$0xf] }
 0x146   :  { %v963_v54 = vadd.f32 %v962_v43, %v935_v49  ;;  %v3493_v43 = vld [vmem:[#allocation2 + $0x264] sm:$0xf0]  ;;  %1614 = vmatpush.bf16.msra.mxu3 %v2837_v38  ;;  %v2940_v49 = vld [vmem:[#allocation2 + $0x140] sm:$0xf]  ;;  %v3483_v38 = vld [vmem:[#allocation2 + $0x214] sm:$0xf0] }
 0x14b   :  { %v937_v23 = vpop.f32.mrf.mxu0 }
 0x14c   :  { %v938_v41 = vadd.f32 %v937_v23, %v910_v55  ;;  %v965_v45 = vpop.f32.mrf.mxu1 }
 0x14e   :  { %v966_v60 = vadd.f32 %v965_v45, %v938_v41  ;;  %v2956_v41 = vld [vmem:[#allocation2 + $0x160] sm:$0xf]  ;;  %v3461_v45 = vld [vmem:[#allocation2 + $0x164] sm:$0xf0] }
 0x14f   :  { %v2957_v17 = vor.u32 %v3461_v45, %v2956_v41  ;;  %v3451_v41 = vld [vmem:[#allocation2 + $0x114] sm:$0xf0]  ;;  %v2980_v45 = vld [vmem:[#allocation2 + $0x190] sm:$0xf] }
 0x150   :  { %v978_v36 = vmax.f32 %v826_v20, %v966_v60  ;;  %v767_v20 = vadd.f32 %v4446_v9, %v739_v13 }
 0x152   :  { %v795_v0 = vadd.f32 %v4448_v56, %v767_v20 }
 0x153   :  { %v939_v27 = vpop.f32.mrf.mxu0 }
 0x154   :  { %v940_v48 = vadd.f32 %v939_v27, %v912_v4  ;;  %v967_v63 = vpop.f32.mrf.mxu1  ;;  %v823_v9 = vadd.f32 %v4473_v59, %v795_v0  ;;  %v3415_v59 = vld [vmem:[%s4669_s3 + $0x18] sm:$0xff]  ;;  %v2828_v27 = vld [vmem:[#allocation2 + $0x60] sm:$0xf] }
 0x155   :  { %v2812_v0 = vld [vmem:[#allocation2 + $0x40] sm:$0xf] }
 0x156   :  { %v968_v46 = vadd.f32 %v967_v63, %v940_v48  ;;  %v977_v28 = vmax.f32 %v823_v9, %v963_v54  ;;  %v2829_v63 = vor.u32 %v3429_v30, %v2828_v27  ;;  %v3005_v54 = vor.u32 %v3473_v12, %v3004_v62  ;;  %v3419_v27 = vld [vmem:[#allocation2 + $0x14] sm:$0xf0]  ;;  %v3462_v62 = vld [vmem:[#allocation2 + $0x174] sm:$0xf]  ;;  %v2966_v12 = vld [vmem:[#allocation2 + $0x178] sm:$0xf0] }
 0x158   :  { %v979_v39 = vmax.f32 %v828_v35, %v968_v46  ;;  %v990_v47 = vpack.c.bf16 %v977_v28, %v976_v2  ;;  %v3084_v2 = vld [vmem:[#allocation2 + $0x260] sm:$0xf]  ;;  %v3076_v35 = vld [vmem:[#allocation2 + $0x250] sm:$0xf]  ;;  %1615 = vmatpush.bf16.msra.mxu3 %v2829_v63 }
 0x159   :  { %v3085_v23 = vor.u32 %v3493_v43, %v3084_v2  ;;  %v3077_v46 = vor.u32 %v3491_v7, %v3076_v35  ;;  %v2996_v28 = vld [vmem:[#allocation2 + $0x1b0] sm:$0xf]  ;;  %v3036_v63 = vld [vmem:[#allocation2 + $0x200] sm:$0xf]  ;;  %v3481_v35 = vld [vmem:[#allocation2 + $0x204] sm:$0xf0] }
 0x15a   :  { %v991_v55 = vpack.c.bf16 %v979_v39, %v978_v36  ;;  %v3477_v36 = vld [vmem:[#allocation2 + $0x1e4] sm:$0xf0]  ;;  %v2948_v39 = vld [vmem:[#allocation2 + $0x150] sm:$0xf]  ;;  %v3037_v7 = vor.u32 %v3481_v35, %v3036_v63 }
 0x15b   :  { %v942_v11 = vpop.f32.mrf.mxu0  ;;  %v3021_v48 = vor.u32 %v3477_v36, %v3020_v57  ;;  %v3044_v2 = vld [vmem:[#allocation2 + $0x210] sm:$0xf] }
 0x15c   :  { %v943_v14 = vadd.f32 %v942_v11, %v915_v8  ;;  %v970_v10 = vpop.f32.mrf.mxu1  ;;  %v3012_v8 = vld [vmem:[#allocation2 + $0x1d0] sm:$0xf]  ;;  %v3475_v11 = vld [vmem:[#allocation2 + $0x1d4] sm:$0xf0]  ;;  %v3045_v43 = vor.u32 %v3483_v38, %v3044_v2  ;;  %v3472_v38 = vld [vmem:[#allocation2 + $0x1c4] sm:$0xf] }
 0x15d   :  { %v3013_v13 = vor.u32 %v3475_v11, %v3012_v8  ;;  %v2788_v36 = vld [vmem:[#allocation2 + $0x10] sm:$0xf]  ;;  %v3465_v11 = vld [vmem:[#allocation2 + $0x184] sm:$0xf0]  ;;  %v3443_v2 = vld [vmem:[#allocation2 + $0xd4] sm:$0xf0] }
 0x15e   :  { %v971_v19 = vadd.f32 %v970_v10, %v943_v14  ;;  %v2820_v14 = vld [vmem:[#allocation2 + $0x50] sm:$0xf]  ;;  %v3427_v10 = vld [vmem:[#allocation2 + $0x54] sm:$0xf0] }
 0x15f   :  { %v2821_v15 = vor.u32 %v3427_v10, %v2820_v14  ;;  %v2780_v14 = vld [vmem:[#allocation2] sm:$0xf]  ;;  %v3417_v10 = vld [vmem:[#allocation2 + $0x4] sm:$0xf0] }
 0x160   :  { %v980_v58 = vmax.f32 %v831_v5, %v971_v19  ;;  %v958_v5 = vadd.f32 %v957_v32, %v930_v50  ;;  %v3479_v32 = vld [vmem:[#allocation2 + $0x1f4] sm:$0xf0]  ;;  %v3489_v19 = vld [vmem:[#allocation2 + $0x244] sm:$0xf0] }
 0x161   :  { %v3029_v37 = vor.u32 %v3479_v32, %v3028_v31  ;;  %v3069_v20 = vor.u32 %v3489_v19, %v3068_v18  ;;  %1616 = vmatpush.bf16.msra.mxu3 %v2821_v15  ;;  %v3425_v50 = vld [vmem:[#allocation2 + $0x44] sm:$0xf0]  ;;  %v2781_v15 = vor.u32 %v3417_v10, %v2780_v14  ;;  %v3478_v18 = vld [vmem:[#allocation2 + $0x1f4] sm:$0xf]  ;;  %v3030_v19 = vld [vmem:[#allocation2 + $0x1f8] sm:$0xf0] }
 0x162   :  { %v992_v4 = vpack.c.bf16 %v980_v58, %v980_v58  ;;  %v975_v44 = vmax.f32 %v818_v34, %v958_v5  ;;  %v3457_v58 = vld [vmem:[#allocation2 + $0x144] sm:$0xf0]  ;;  %v3455_v5 = vld [vmem:[#allocation2 + $0x134] sm:$0xf0] }
 0x163   :  { %v944_v21 = vpop.f32.mrf.mxu0  ;;  %1668 = vmatpush.bf16.msrb.mxu1 %v3029_v37  ;;  %v2933_v34 = vor.u32 %v3455_v5, %v2932_v25  ;;  %v3469_v32 = vld [vmem:[#allocation2 + $0x1a4] sm:$0xf0]  ;;  %v3444_v25 = vld [vmem:[#allocation2 + $0xe4] sm:$0xf]  ;;  %v2894_v5 = vld [vmem:[#allocation2 + $0xe8] sm:$0xf0] }
 0x164   :  { %v972_v40 = vpop.f32.mrf.mxu1  ;;  %v1027_v42 = vsel %vm90_vm3, %v992_v4, 0  ;;  %v989_v56 = vpack.c.bf16 %v975_v44, %v974_v52  ;;  %v3463_v52 = vld [vmem:[#allocation2 + $0x174] sm:$0xf0]  ;;  %v2941_v4 = vor.u32 %v3457_v58, %v2940_v49  ;;  %v2813_v21 = vor.u32 %v3425_v50, %v2812_v0  ;;  %v3421_v37 = vld [vmem:[#allocation2 + $0x24] sm:$0xf0] }
 0x165   :  { %1033 = vmatpush.bf16.msra.mxu2 %v1027_v42  ;;  %v2965_v33 = vor.u32 %v3463_v52, %v2964_v22  ;;  %v3060_v40 = vld [vmem:[#allocation2 + $0x230] sm:$0xf]  ;;  %v3487_v42 = vld [vmem:[#allocation2 + $0x234] sm:$0xf0]  ;;  %v3453_v22 = vld [vmem:[#allocation2 + $0x124] sm:$0xf0] }
 0x166   :  { %v3061_v9 = vor.u32 %v3487_v42, %v3060_v40  ;;  %1617 = vmatpush.bf16.msra.mxu3 %v2813_v21  ;;  %v3471_v44 = vld [vmem:[#allocation2 + $0x1b4] sm:$0xf0]  ;;  %v2925_v31 = vor.u32 %v3453_v22, %v2924_v6  ;;  %v3446_v49 = vld [vmem:[#allocation2 + $0xf4] sm:$0xf]  ;;  %v2902_v58 = vld [vmem:[#allocation2 + $0xf8] sm:$0xf0] }
 0x167   :  { %1650 = vmatpush.bf16.msrb.mxu0 %v2965_v33  ;;  %1669 = vmatpush.bf16.msrb.mxu1 %v3021_v48  ;;  %v2796_v33 = vld [vmem:[#allocation2 + $0x20] sm:$0xf]  ;;  %v2789_v48 = vor.u32 %v3419_v27, %v2788_v36  ;;  %v2900_v0 = vld [vmem:[#allocation2 + $0xf0] sm:$0xf]  ;;  %v3447_v50 = vld [vmem:[#allocation2 + $0xf4] sm:$0xf0] }
 0x168   :  { %v2797_v26 = vor.u32 %v3421_v37, %v2796_v33  ;;  %v2901_v21 = vor.u32 %v3447_v50, %v2900_v0  ;;  %v3476_v40 = vld [vmem:[#allocation2 + $0x1e4] sm:$0xf]  ;;  %v3022_v42 = vld [vmem:[#allocation2 + $0x1e8] sm:$0xf0]  ;;  %v3014_v6 = vld [vmem:[#allocation2 + $0x1d8] sm:$0xf0] }
 0x169   :  { %1034 = vmatpush.bf16.msra.mxu2 %v991_v55  ;;  %v2949_v55 = vor.u32 %v3459_v53, %v2948_v39  ;;  %v3449_v39 = vld [vmem:[#allocation2 + $0x104] sm:$0xf0]  ;;  %v2972_v53 = vld [vmem:[#allocation2 + $0x180] sm:$0xf]  ;;  %v3442_v22 = vld [vmem:[#allocation2 + $0xd4] sm:$0xf] }
 0x16a   :  { %v3458_v33 = vld [vmem:[#allocation2 + $0x154] sm:$0xf]  ;;  %v2950_v37 = vld [vmem:[#allocation2 + $0x158] sm:$0xf0]  ;;  %v3456_v36 = vld [vmem:[#allocation2 + $0x144] sm:$0xf] }
 0x16b   :  { %1651 = vmatpush.bf16.msrb.mxu0 %v2957_v17  ;;  %1670 = vmatpush.bf16.msrb.mxu1 %v3013_v13  ;;  %v3467_v17 = vld [vmem:[#allocation2 + $0x194] sm:$0xf0]  ;;  %v2973_v13 = vor.u32 %v3465_v11, %v2972_v53  ;;  %v2876_v27 = vld [vmem:[#allocation2 + $0xc0] sm:$0xf]  ;;  %v2998_v11 = vld [vmem:[#allocation2 + $0x1b8] sm:$0xf0] }
 0x16c   :  { %v2981_v30 = vor.u32 %v3467_v17, %v2980_v45  ;;  %v3440_v45 = vld [vmem:[#allocation2 + $0xc4] sm:$0xf]  ;;  %v2990_v50 = vld [vmem:[#allocation2 + $0x1a8] sm:$0xf0] }
 0x16d   :  { %1035 = vmatpush.bf16.msra.mxu2 %v990_v47  ;;  %v2804_v47 = vld [vmem:[#allocation2 + $0x30] sm:$0xf]  ;;  %v3468_v0 = vld [vmem:[#allocation2 + $0x1a4] sm:$0xf] }
 0x16f   :  { %1652 = vmatpush.bf16.msrb.mxu0 %v2949_v55  ;;  %1671 = vmatpush.bf16.msrb.mxu1 %v3005_v54  ;;  %v2969_v54 = vor.u32 %v3462_v62, %v2966_v12 }
 0x171   :  { %1036 = vmatpush.bf16.msra.mxu2 %v989_v56  ;;  %v3423_v56 = vld [vmem:[#allocation2 + $0x34] sm:$0xf0] }
 0x173   :  { %1653 = vmatpush.bf16.msrb.mxu0 %v2941_v4  ;;  %v2905_v4 = vor.u32 %v3446_v49, %v2902_v58  ;;  %v2868_v49 = vld [vmem:[#allocation2 + $0xb0] sm:$0xf]  ;;  %v3439_v58 = vld [vmem:[#allocation2 + $0xb4] sm:$0xf0] }
 0x174   :  { %2774 = vmatmul.msk.bf16.vlgmr.msra.gmra.mxu2 %vm1013_vm7, %v3412_v51  ;;  %v2997_v51 = vor.u32 %v3471_v44, %v2996_v28  ;;  %v3460_v28 = vld [vmem:[#allocation2 + $0x164] sm:$0xf]  ;;  %v2897_v44 = vor.u32 %v3444_v25, %v2894_v5  ;;  %v2869_v12 = vor.u32 %v3439_v58, %v2868_v49 }
 0x175   :  { %1686 = vmatpush.bf16.msrb.mxu2 %v3093_v24  ;;  %v2988_v24 = vld [vmem:[#allocation2 + $0x1a0] sm:$0xf] }
 0x176   :  { %1672 = vmatpush.bf16.msrb.mxu1 %v2997_v51  ;;  %v2989_v61 = vor.u32 %v3469_v32, %v2988_v24  ;;  %v3445_v51 = vld [vmem:[#allocation2 + $0xe4] sm:$0xf0]  ;;  %v2886_v32 = vld [vmem:[#allocation2 + $0xd8] sm:$0xf0] }
 0x177   :  { %1654 = vmatpush.bf16.msrb.mxu0 %v2933_v34  ;;  %v4518_v34 = vld [vmem:[%s4668_s2] ss:$0 sm:$0xff] }
 0x179   :  { %1687 = vmatpush.bf16.msrb.mxu2 %v3085_v23  ;;  %v2916_v23 = vld [vmem:[#allocation2 + $0x110] sm:$0xf] }
 0x17a   :  { %1673 = vmatpush.bf16.msrb.mxu1 %v2989_v61  ;;  %v2917_v57 = vor.u32 %v3451_v41, %v2916_v23  ;;  %v2889_v61 = vor.u32 %v3442_v22, %v2886_v32  ;;  %v3006_v41 = vld [vmem:[#allocation2 + $0x1c8] sm:$0xf0]  ;;  %v2854_v22 = vld [vmem:[#allocation2 + $0x98] sm:$0xf0] }
 0x17b   :  { %1655 = vmatpush.bf16.msrb.mxu0 %v2925_v31  ;;  %v3009_v17 = vor.u32 %v3472_v38, %v3006_v41  ;;  %v3435_v38 = vld [vmem:[#allocation2 + $0x94] sm:$0xf0] }
 0x17d   :  { %1688 = vmatpush.bf16.msrb.mxu2 %v3077_v46  ;;  %v2908_v46 = vld [vmem:[#allocation2 + $0x100] sm:$0xf] }
 0x17e   :  { %1674 = vmatpush.bf16.msrb.mxu1 %v2981_v30  ;;  %v2909_v55 = vor.u32 %v3449_v39, %v2908_v46 }
 0x17f   :  { %1656 = vmatpush.bf16.msrb.mxu0 %v2917_v57  ;;  %v2878_v57 = vld [vmem:[#allocation2 + $0xc8] sm:$0xf0] }
 0x180   :  { %v2881_v63 = vor.u32 %v3440_v45, %v2878_v57  ;;  %v3432_v45 = vld [vmem:[#allocation2 + $0x84] sm:$0xf]  ;;  %v2846_v57 = vld [vmem:[#allocation2 + $0x88] sm:$0xf0] }
 0x181   :  { %1689 = vmatpush.bf16.msrb.mxu2 %v3069_v20  ;;  %v3033_v20 = vor.u32 %v3478_v18, %v3030_v19  ;;  %v3454_v18 = vld [vmem:[#allocation2 + $0x134] sm:$0xf] }
 0x182   :  { %1675 = vmatpush.bf16.msrb.mxu1 %v2973_v13  ;;  %v3438_v13 = vld [vmem:[#allocation2 + $0xb4] sm:$0xf] }
 0x183   :  { %1657 = vmatpush.bf16.msrb.mxu0 %v2909_v55  ;;  %v3470_v55 = vld [vmem:[#allocation2 + $0x1b4] sm:$0xf] }
 0x184   :  { %2775 = vmatmul.msk.bf16.gmra.mxu2 %vm1013_vm7, %v3413_v1  ;;  %v2805_v1 = vor.u32 %v3423_v56, %v2804_v47  ;;  %v2958_v47 = vld [vmem:[#allocation2 + $0x168] sm:$0xf0]  ;;  %v2892_v56 = vld [vmem:[#allocation2 + $0xe0] sm:$0xf]  ;;  %v3001_v14 = vor.u32 %v3470_v55, %v2998_v11 }
 0x185   :  { %1690 = vmatpush.bf16.msrb.mxu2 %v3061_v9  ;;  %v3025_v9 = vor.u32 %v3476_v40, %v3022_v42  ;;  %v2862_v40 = vld [vmem:[#allocation2 + $0xa8] sm:$0xf0]  ;;  %v3452_v42 = vld [vmem:[#allocation2 + $0x124] sm:$0xf] }
 0x186   :  { %1618 = vmatpush.bf16.msra.mxu3 %v2805_v1  ;;  %1740 = vmatpush.bf16.msra.mxu1 %v2969_v54  ;;  %v2993_v54 = vor.u32 %v3468_v0, %v2990_v50 }
 0x187   :  { %1722 = vmatpush.bf16.msra.mxu0 %v2905_v4 }
 0x18a   :  { %1619 = vmatpush.bf16.msra.mxu3 %v2797_v26  ;;  %v2884_v26 = vld [vmem:[#allocation2 + $0xd0] sm:$0xf] }
 0x18b   :  { %1723 = vmatpush.bf16.msra.mxu0 %v2897_v44  ;;  %v2885_v23 = vor.u32 %v3443_v2, %v2884_v26  ;;  %v2926_v44 = vld [vmem:[#allocation2 + $0x128] sm:$0xf0] }
 0x18e   :  { %1620 = vmatpush.bf16.msra.mxu3 %v2789_v48  ;;  %v3441_v48 = vld [vmem:[#allocation2 + $0xc4] sm:$0xf0] }
 0x18f   :  { %1724 = vmatpush.bf16.msra.mxu0 %v2889_v61  ;;  %v2852_v61 = vld [vmem:[#allocation2 + $0x90] sm:$0xf] }
 0x192   :  { %1621 = vmatpush.bf16.msra.mxu3 %v2781_v15  ;;  %v2870_v15 = vld [vmem:[#allocation2 + $0xb8] sm:$0xf0] }
 0x193   :  { %1725 = vmatpush.bf16.msra.mxu0 %v2881_v63  ;;  %v2873_v19 = vor.u32 %v3438_v13, %v2870_v15  ;;  %v2849_v63 = vor.u32 %v3432_v45, %v2846_v57 }
 0x194   :  { %2776 = vmatmul.msk.bf16.gmra.mxu2 %vm1013_vm7, %v3414_v3  ;;  %v3052_v3 = vld [vmem:[#allocation2 + $0x220] sm:$0xf] }
 0x196   :  { %1632 = vmatpush.bf16.msrb.mxu3 %v2901_v21  ;;  %v3436_v21 = vld [vmem:[#allocation2 + $0xa4] sm:$0xf] }
 0x197   :  { %1726 = vmatpush.bf16.msra.mxu0 %v2873_v19 }
 0x1a4   :  { %2777 = vmatmul.msk.bf16.gmra.mxu2 %vm1013_vm7, %v3415_v59  ;;  %v3485_v59 = vld [vmem:[#allocation2 + $0x224] sm:$0xf0] }
 0x1a5   :  { %v3053_v29 = vor.u32 %v3485_v59, %v3052_v3  ;;  %v2961_v3 = vor.u32 %v3460_v28, %v2958_v47  ;;  %v2893_v59 = vor.u32 %v3445_v51, %v2892_v56  ;;  %v2865_v28 = vor.u32 %v3436_v21, %v2862_v40  ;;  %v2860_v51 = vld [vmem:[#allocation2 + $0xa0] sm:$0xf]  ;;  %v2838_v21 = vld [vmem:[#allocation2 + $0x78] sm:$0xf0]  ;;  %v3428_v40 = vld [vmem:[#allocation2 + $0x64] sm:$0xf] }
 0x1a6   :  { %v2929_v56 = vor.u32 %v3452_v42, %v2926_v44 }
 0x1a7   :  { %1691 = vmatpush.bf16.msrb.mxu2 %v3053_v29  ;;  %v3474_v29 = vld [vmem:[#allocation2 + $0x1d4] sm:$0xf]  ;;  %1741 = vmatpush.bf16.msra.mxu1 %v2961_v3 }
 0x1a8   :  { %v3017_v31 = vor.u32 %v3474_v29, %v3014_v6  ;;  %1633 = vmatpush.bf16.msrb.mxu3 %v2893_v59  ;;  %v3466_v3 = vld [vmem:[#allocation2 + $0x194] sm:$0xf]  ;;  %v2982_v29 = vld [vmem:[#allocation2 + $0x198] sm:$0xf0]  ;;  %1727 = vmatpush.bf16.msra.mxu0 %v2865_v28 }
 0x1a9   :  { %v3434_v6 = vld [vmem:[#allocation2 + $0x94] sm:$0xf]  ;;  %v2822_v28 = vld [vmem:[#allocation2 + $0x58] sm:$0xf0] }
 0x1aa   :  { %v2857_v32 = vor.u32 %v3434_v6, %v2854_v22 }
 0x1ab   :  { %1692 = vmatpush.bf16.msrb.mxu2 %v3045_v43  ;;  %v2953_v43 = vor.u32 %v3458_v33, %v2950_v37  ;;  %v3450_v33 = vld [vmem:[#allocation2 + $0x114] sm:$0xf]  ;;  %v2918_v37 = vld [vmem:[#allocation2 + $0x118] sm:$0xf0] }
 0x1ac   :  { %1634 = vmatpush.bf16.msrb.mxu3 %v2885_v23  ;;  %v2921_v2 = vor.u32 %v3450_v33, %v2918_v37  ;;  %v2974_v23 = vld [vmem:[#allocation2 + $0x188] sm:$0xf0]  ;;  %1728 = vmatpush.bf16.msra.mxu0 %v2857_v32  ;;  %v3422_v32 = vld [vmem:[#allocation2 + $0x34] sm:$0xf]  ;;  %v2806_v33 = vld [vmem:[#allocation2 + $0x38] sm:$0xf0] }
 0x1ad   :  { %1742 = vmatpush.bf16.msra.mxu1 %v2953_v43  ;;  %v3464_v43 = vld [vmem:[#allocation2 + $0x184] sm:$0xf] }
 0x1ae   :  { %v2977_v41 = vor.u32 %v3464_v43, %v2974_v23  ;;  %v3420_v37 = vld [vmem:[#allocation2 + $0x24] sm:$0xf]  ;;  %v3418_v23 = vld [vmem:[#allocation2 + $0x14] sm:$0xf] }
 0x1af   :  { %1693 = vmatpush.bf16.msrb.mxu2 %v3037_v7  ;;  %v2877_v7 = vor.u32 %v3441_v48, %v2876_v27 }
 0x1b0   :  { %1729 = vmatpush.bf16.msra.mxu0 %v2849_v63 }
 0x1b1   :  { %1635 = vmatpush.bf16.msrb.mxu3 %v2877_v7  ;;  %v3433_v7 = vld [vmem:[#allocation2 + $0x84] sm:$0xf0] }
 0x1b3   :  { %1758 = vmatpush.bf16.msra.mxu2 %v3033_v20  ;;  %v2934_v20 = vld [vmem:[#allocation2 + $0x138] sm:$0xf0] }
 0x1b5   :  { %1636 = vmatpush.bf16.msrb.mxu3 %v2869_v12 }
 0x1b7   :  { %1759 = vmatpush.bf16.msra.mxu2 %v3025_v9 }
 0x1bb   :  { %1760 = vmatpush.bf16.msra.mxu2 %v3017_v31  ;;  %v2985_v31 = vor.u32 %v3466_v3, %v2982_v29 }
 0x1bf   :  { %1761 = vmatpush.bf16.msra.mxu2 %v3009_v17  ;;  %v3448_v17 = vld [vmem:[#allocation2 + $0x104] sm:$0xf] }
 0x1c3   :  { %1762 = vmatpush.bf16.msra.mxu2 %v3001_v14 }
 0x1c7   :  { %1763 = vmatpush.bf16.msra.mxu2 %v2993_v54  ;;  %v3430_v54 = vld [vmem:[#allocation2 + $0x74] sm:$0xf] }
 0x1cb   :  { %1764 = vmatpush.bf16.msra.mxu2 %v2985_v31 }
 0x1cf   :  { %1765 = vmatpush.bf16.msra.mxu2 %v2977_v41 }
 0x1f7   :  { %v4507_v60 = vpop.f32.mrf.mxu2 }
 0x1ff   :  { %v4509_v16 = vpop.f32.mrf.mxu2 }
 0x207   :  { %v4511_v52 = vpop.f32.mrf.mxu2 }
 0x20f   :  { %v4513_v8 = vpop.f32.mrf.mxu2 }
 0x217   :  { %v1048_v1 = vpop.f32.mrf.mxu2 }
 0x218   :  { %v1058_v24 = vmax.f32 %v4507_v60, %v1048_v1  ;;  %v2942_v60 = vld [vmem:[#allocation2 + $0x148] sm:$0xf0]  ;;  %v3437_v1 = vld [vmem:[#allocation2 + $0xa4] sm:$0xf0] }
 0x219   :  { %v2945_v35 = vor.u32 %v3456_v36, %v2942_v60  ;;  %v2910_v60 = vld [vmem:[#allocation2 + $0x108] sm:$0xf0] }
 0x21a   :  { %v1066_v30 = vadd.f32 %v4518_v34, %v1058_v24  ;;  %v2861_v24 = vor.u32 %v3437_v1, %v2860_v51  ;;  %v2913_v11 = vor.u32 %v3448_v17, %v2910_v60  ;;  %v3424_v51 = vld [vmem:[#allocation2 + $0x44] sm:$0xf]  ;;  %v2814_v1 = vld [vmem:[#allocation2 + $0x48] sm:$0xf0] }
 0x21b   :  { %1743 = vmatpush.bf16.msra.mxu1 %v2945_v35  ;;  %v2844_v35 = vld [vmem:[#allocation2 + $0x80] sm:$0xf]  ;;  %v2817_v6 = vor.u32 %v3424_v51, %v2814_v1  ;;  %v3416_v17 = vld [vmem:[#allocation2 + $0x4] sm:$0xf]  ;;  %v2782_v60 = vld [vmem:[#allocation2 + $0x8] sm:$0xf0] }
 0x21c   :  { %v4522_v39 = vmax.f32 %v1066_v30, 0.0  ;;  %1637 = vmatpush.bf16.msrb.mxu3 %v2861_v24  ;;  %v2845_v58 = vor.u32 %v3433_v7, %v2844_v35  ;;  %v3094_v35 = vld [vmem:[#allocation2 + $0x278] sm:$0xf0]  ;;  %v3492_v7 = vld [vmem:[#allocation2 + $0x264] sm:$0xf] }
 0x21e   :  { %v1119_v62 = vrot.slane %v4522_v39, 4  ;;  %v1097_v27 = vrot.slane %v4522_v39, 2  ;;  %v1108_v30 = vrot.slane %v4522_v39, 3 }
 0x21f   :  { %v1050_v46 = vpop.f32.mrf.mxu2 }
 0x220   :  { %v1059_v53 = vmax.f32 %v4509_v16, %v1050_v46  ;;  %v2937_v16 = vor.u32 %v3454_v18, %v2934_v20 }
 0x222   :  { %v1067_v10 = vadd.f32 %v4518_v34, %v1059_v53  ;;  %1744 = vmatpush.bf16.msra.mxu1 %v2937_v16 }
 0x224   :  { %v4527_v4 = vmax.f32 %v1067_v10, 0.0 }
 0x226   :  { %v4530_v9 = vrot.slane %v4527_v4, 4  ;;  %v1098_v25 = vrot.slane %v4527_v4, 2  ;;  %v1109_v5 = vrot.slane %v4527_v4, 3  ;;  %1745 = vmatpush.bf16.msra.mxu1 %v2929_v56  ;;  %v1089_v43 = vrot.slane %v4527_v4, 5 }
 0x227   :  { %v1053_v47 = vpop.f32.mrf.mxu2  ;;  %v1084_v45 = vrot.slane %v4527_v4, 1 }
 0x228   :  { %v1060_v59 = vmax.f32 %v4511_v52, %v1053_v47  ;;  %v2853_v52 = vor.u32 %v3435_v38, %v2852_v61  ;;  %v1120_v48 = vsel %vm90_vm3, %v1119_v62, %v4530_v9  ;;  %v1099_v13 = vsel %vm132_vm1, %v1097_v27, %v1098_v25 }
 0x229   :  { %v1110_v15 = vsel %vm157_vm2, %v1108_v30, %v1109_v5  ;;  %v2809_v61 = vor.u32 %v3422_v32, %v2806_v33  ;;  %v1083_v27 = vrot.slane %v4522_v39, 1 }
 0x22a   :  { %v1068_v26 = vadd.f32 %v4518_v34, %v1060_v59  ;;  %1746 = vmatpush.bf16.msra.mxu1 %v2921_v2  ;;  %1638 = vmatpush.bf16.msrb.mxu3 %v2853_v52  ;;  %v2790_v52 = vld [vmem:[#allocation2 + $0x18] sm:$0xf0] }
 0x22b   :  { %v2793_v57 = vor.u32 %v3418_v23, %v2790_v52 }
 0x22c   :  { %v4536_v36 = vmax.f32 %v1068_v26, 0.0  ;;  %v2798_v26 = vld [vmem:[#allocation2 + $0x28] sm:$0xf0] }
 0x22d   :  { %v2801_v38 = vor.u32 %v3420_v37, %v2798_v26 }
 0x22e   :  { %v1102_v46 = vrot.slane %v4536_v36, 6  ;;  %v1113_v53 = vrot.slane %v4536_v36, 7  ;;  %v1123_v55 = vsel %vm144_vm5, %v4530_v9, %v4536_v36  ;;  %v1077_v18 = vrot.slane %v4536_v36, 4  ;;  %1747 = vmatpush.bf16.msra.mxu1 %v2913_v11  ;;  %1639 = vmatpush.bf16.msrb.mxu3 %v2845_v58  ;;  %v3078_v11 = vld [vmem:[#allocation2 + $0x258] sm:$0xf0] }
 0x22f   :  { %v1055_v14 = vpop.f32.mrf.mxu2  ;;  %v4547_v10 = vpack.c.bf16 %v1123_v55, %v1120_v48  ;;  %v1090_v2 = vrot.slane %v4536_v36, 5  ;;  %v1085_v36 = vsel %vm107_vm0, %v1083_v27, %v1084_v45  ;;  %v2785_v48 = vor.u32 %v3416_v17, %v2782_v60  ;;  %v3490_v55 = vld [vmem:[#allocation2 + $0x254] sm:$0xf] }
 0x230   :  { %v1061_v19 = vmax.f32 %v4513_v8, %v1055_v14  ;;  %v1107_v20 = vsel %vm144_vm5, %v1098_v25, %v1102_v46  ;;  %v1118_v49 = vsel %vm144_vm5, %v1109_v5, %v1113_v53  ;;  %v1078_v12 = vsel %vm90_vm3, %v4530_v9, %v1077_v18  ;;  %v2830_v9 = vld [vmem:[#allocation2 + $0x68] sm:$0xf0]  ;;  %v3426_v5 = vld [vmem:[#allocation2 + $0x54] sm:$0xf] }
 0x231   :  { %1694 = vmatmul.bf16.vlgmr.msrb.gmra.mxu2 %v4547_v10  ;;  %v4556_v62 = vpack.c.bf16 %v1107_v20, %v1099_v13  ;;  %v1127_v16 = vpack.c.bf16 %v1118_v49, %v1110_v15  ;;  %v1081_v50 = vsel %vm144_vm5, %v4527_v4, %v1078_v12  ;;  %v2833_v25 = vor.u32 %v3428_v40, %v2830_v9  ;;  %v3494_v4 = vld [vmem:[#allocation2 + $0x274] sm:$0xf]  ;;  %v3488_v15 = vld [vmem:[#allocation2 + $0x244] sm:$0xf] }
 0x232   :  { %v1069_v0 = vadd.f32 %v4518_v34, %v1061_v19  ;;  %v4565_v8 = vpack.c.bf16 %v1081_v50, %v4522_v39  ;;  %v2841_v34 = vor.u32 %v3430_v54, %v2838_v21  ;;  %v2825_v56 = vor.u32 %v3426_v5, %v2822_v28  ;;  %v3486_v58 = vld [vmem:[#allocation2 + $0x234] sm:$0xf]  ;;  %v3046_v21 = vld [vmem:[#allocation2 + $0x218] sm:$0xf0] }
 0x233   :  { %1658 = vmatmul.bf16.vlgmr.msrb.gmra.mxu0 %v4556_v62  ;;  %1676 = vmatmul.bf16.vlgmr.msrb.gmra.mxu1 %v1127_v16  ;;  %v4579_v31 = vpack.c.bf16 %v1077_v18, %v1077_v18  ;;  %v1091_v41 = vsel %vm119_vm4, %v1089_v43, %v1090_v2  ;;  %v3081_v13 = vor.u32 %v3490_v55, %v3078_v11  ;;  %v3070_v18 = vld [vmem:[#allocation2 + $0x248] sm:$0xf0]  ;;  %v3482_v54 = vld [vmem:[#allocation2 + $0x214] sm:$0xf] }
 0x234   :  { %1622 = vmatmul.bf16.vlgmr.msra.gmra.mxu3 %v4565_v8  ;;  %v4568_v42 = vmax.f32 %v1069_v0, 0.0  ;;  %v1096_v30 = vsel %vm144_vm5, %v1084_v45, %v1091_v41  ;;  %v3073_v20 = vor.u32 %v3488_v15, %v3070_v18  ;;  %v3054_v0 = vld [vmem:[#allocation2 + $0x228] sm:$0xf0]  ;;  %v3049_v40 = vor.u32 %v3482_v54, %v3046_v21 }
 0x235   :  { %1704 = vmatpush.bf16.msra.mxu3 %v2841_v34  ;;  %v1125_v63 = vpack.c.bf16 %v1096_v30, %v1085_v36  ;;  %v3038_v34 = vld [vmem:[#allocation2 + $0x208] sm:$0xf0] }
 0x236   :  { %v1103_v44 = vrot.slane %v4568_v42, 6  ;;  %v1114_v47 = vrot.slane %v4568_v42, 7  ;;  %v4576_v29 = vpack.c.bf16 %v4568_v42, %v4568_v42  ;;  %v1092_v14 = vrot.slane %v4568_v42, 5  ;;  %v3480_v42 = vld [vmem:[#allocation2 + $0x204] sm:$0xf] }
 0x237   :  { %v3041_v9 = vor.u32 %v3480_v42, %v3038_v34 }
 0x238   :  { %v1104_v3 = vsel %vm144_vm5, %v1102_v46, %v1103_v44  ;;  %v1115_v59 = vsel %vm169_vm6, %v1113_v53, %v1114_v47  ;;  %v3097_v46 = vor.u32 %v3494_v4, %v3094_v35  ;;  %v3086_v53 = vld [vmem:[#allocation2 + $0x268] sm:$0xf0]  ;;  %v1093_v19 = vsel %vm119_vm4, %v1090_v2, %v1092_v14 }
 0x239   :  { %1705 = vmatpush.bf16.msra.mxu3 %v2833_v25  ;;  %v1131_v22 = vpack.c.bf16 %v1104_v3, %v1104_v3  ;;  %v1132_v24 = vpack.c.bf16 %v1115_v59, %v1115_v59  ;;  %v3089_v39 = vor.u32 %v3492_v7, %v3086_v53  ;;  %v1130_v49 = vpack.c.bf16 %v1093_v19, %v1093_v19 }
 0x23d   :  { %1706 = vmatpush.bf16.msra.mxu3 %v2825_v56 }
 0x241   :  { %1699 = vmatmul.bf16.gmra.mxu2 %v4576_v29  ;;  %1707 = vmatpush.bf16.msra.mxu3 %v2817_v6 }
 0x243   :  { %1663 = vmatmul.bf16.gmra.mxu0 %v1131_v22  ;;  %1681 = vmatmul.bf16.gmra.mxu1 %v1132_v24 }
 0x244   :  { %1627 = vmatmul.bf16.gmra.mxu3 %v4579_v31 }
 0x245   :  { %1708 = vmatpush.bf16.msra.mxu3 %v2809_v61 }
 0x249   :  { %1709 = vmatpush.bf16.msra.mxu3 %v2801_v38 }
 0x24d   :  { %1710 = vmatpush.bf16.msra.mxu3 %v2793_v57 }
 0x251   :  { %1766 = vmatmul.bf16.vlgmr.msra.gmra.mxu2 %v1127_v16  ;;  %1711 = vmatpush.bf16.msra.mxu3 %v2785_v48  ;;  %v3484_v16 = vld [vmem:[#allocation2 + $0x224] sm:$0xf] }
 0x252   :  { %v3057_v50 = vor.u32 %v3484_v16, %v3054_v0 }
 0x253   :  { %1730 = vmatmul.bf16.vlgmr.msra.gmra.mxu0 %v1125_v63  ;;  %1748 = vmatmul.bf16.vlgmr.msra.gmra.mxu1 %v4556_v62  ;;  %v3062_v62 = vld [vmem:[#allocation2 + $0x238] sm:$0xf0] }
 0x254   :  { %1640 = vmatmul.bf16.vlgmr.msrb.gmra.mxu3 %v1125_v63  ;;  %v3065_v12 = vor.u32 %v3486_v58, %v3062_v62 }
 0x255   :  { %1776 = vmatpush.bf16.msrb.mxu3 %v3097_v46 }
 0x259   :  { %1777 = vmatpush.bf16.msrb.mxu3 %v3089_v39 }
 0x25d   :  { %1778 = vmatpush.bf16.msrb.mxu3 %v3081_v13 }
 0x261   :  { %1771 = vmatmul.bf16.gmra.mxu2 %v1132_v24  ;;  %1779 = vmatpush.bf16.msrb.mxu3 %v3073_v20 }
 0x263   :  { %1735 = vmatmul.bf16.gmra.mxu0 %v1130_v49  ;;  %1753 = vmatmul.bf16.gmra.mxu1 %v1131_v22 }
 0x264   :  { %1645 = vmatmul.bf16.gmra.mxu3 %v1130_v49 }
 0x265   :  { %1780 = vmatpush.bf16.msrb.mxu3 %v3065_v12 }
 0x269   :  { %1781 = vmatpush.bf16.msrb.mxu3 %v3057_v50 }
 0x26d   :  { %1782 = vmatpush.bf16.msrb.mxu3 %v3049_v40 }
 0x271   :  { %1783 = vmatpush.bf16.msrb.mxu3 %v3041_v9 }
 0x274   :  { %1712 = vmatmul.bf16.vlgmr.msra.gmra.mxu3 %v4565_v8 }
 0x284   :  { %1717 = vmatmul.bf16.gmra.mxu3 %v4579_v31 }
 0x294   :  { %1784 = vmatmul.bf16.vlgmr.msrb.gmra.mxu3 %v4547_v10 }
 0x2a4   :  { %1789 = vmatmul.bf16.gmra.mxu3 %v4576_v29 }
 0x2b0   :  { %v1659_v25 = vpop.f32.mrf.mxu0  ;;  %v1677_v5 = vpop.f32.mrf.mxu1 }
 0x2b4   :  { %v1695_v28 = vpop.f32.mrf.mxu2 }
 0x2b7   :  { %v1623_v44 = vpop.f32.mrf.mxu3 }
 0x2b8   :  { %v1661_v47 = vpop.f32.mrf.mxu0  ;;  %v1679_v56 = vpop.f32.mrf.mxu1 }
 0x2bc   :  { %v1697_v51 = vpop.f32.mrf.mxu2 }
 0x2bf   :  { %v1625_v1 = vpop.f32.mrf.mxu3 }
 0x2c0   :  { %v1664_v3 = vpop.f32.mrf.mxu0  ;;  %v1682_v59 = vpop.f32.mrf.mxu1 }
 0x2c4   :  { %v1700_v6 = vpop.f32.mrf.mxu2 }
 0x2c7   :  { %v1628_v22 = vpop.f32.mrf.mxu3 }
 0x2c8   :  { %v1666_v24 = vpop.f32.mrf.mxu0  ;;  %v1684_v8 = vpop.f32.mrf.mxu1 }
 0x2c9   :  { %v3501_v24 = vld [vmem:[#allocation5 + $0x18] sm:$0xff]  ;;  %v3497_v8 = vld [vmem:[%s4672_s6 + $0x8] sm:$0xff] }
 0x2cc   :  { %v1702_v32 = vpop.f32.mrf.mxu2 }
 0x2cd   :  { %v3521_v32 = vld [vmem:[#allocation5 + $0xb8] sm:$0xff] }
 0x2ce   :  { %2214 = vmatpush.bf16.msra.mxu3 %v3521_v32 }
 0x2cf   :  { %v1630_v31 = vpop.f32.mrf.mxu3 }
 0x2d0   :  { %v1731_v33 = vpop.f32.mrf.mxu0  ;;  %v1749_v10 = vpop.f32.mrf.mxu1  ;;  %v3500_v31 = vld [vmem:[#allocation5 + $0x10] sm:$0xff] }
 0x2d4   :  { %v1767_v37 = vpop.f32.mrf.mxu2 }
 0x2d7   :  { %v1641_v29 = vpop.f32.mrf.mxu3 }
 0x2d8   :  { %v1733_v61 = vpop.f32.mrf.mxu0  ;;  %v1642_v26 = vadd.f32 %v1641_v29, %v1623_v44  ;;  %v1751_v2 = vpop.f32.mrf.mxu1  ;;  %v3529_v29 = vld [vmem:[#allocation5 + $0xf8] sm:$0xff] }
 0x2da   :  { %v1660_v38 = vadd.f32 %v1659_v25, %v1642_v26  ;;  %v3505_v25 = vld [vmem:[#allocation5 + $0x38] sm:$0xff]  ;;  %v3528_v26 = vld [vmem:[#allocation5 + $0xf0] sm:$0xff] }
 0x2db   :  { %2188 = vmatpush.bf16.msrb.mxu1 %v3505_v25 }
 0x2dc   :  { %v1769_v43 = vpop.f32.mrf.mxu2  ;;  %v1678_v23 = vadd.f32 %v1677_v5, %v1660_v38  ;;  %v3498_v38 = vld [vmem:[#allocation5] sm:$0xff] }
 0x2de   :  { %v1696_v52 = vadd.f32 %v1695_v28, %v1678_v23  ;;  %v3513_v28 = vld [vmem:[#allocation5 + $0x78] sm:$0xff] }
 0x2df   :  { %v1643_v41 = vpop.f32.mrf.mxu3  ;;  %2201 = vmatpush.bf16.msrb.mxu2 %v3513_v28  ;;  %v3537_v23 = vld [vmem:[#allocation5 + $0x138] sm:$0xff] }
 0x2e0   :  { %v1736_v45 = vpop.f32.mrf.mxu0  ;;  %v1644_v57 = vadd.f32 %v1643_v41, %v1625_v1  ;;  %v1754_v17 = vpop.f32.mrf.mxu1  ;;  %v3503_v1 = vld [vmem:[#allocation5 + $0x28] sm:$0xff] }
 0x2e1   :  { %v3527_v41 = vld [vmem:[#allocation5 + $0xe8] sm:$0xff] }
 0x2e2   :  { %v1662_v60 = vadd.f32 %v1661_v47, %v1644_v57  ;;  %v3504_v47 = vld [vmem:[#allocation5 + $0x30] sm:$0xff] }
 0x2e3   :  { %2189 = vmatpush.bf16.msrb.mxu1 %v3504_v47  ;;  %v3536_v57 = vld [vmem:[#allocation5 + $0x130] sm:$0xff] }
 0x2e4   :  { %v1772_v27 = vpop.f32.mrf.mxu2  ;;  %v1680_v30 = vadd.f32 %v1679_v56, %v1662_v60  ;;  %v3517_v60 = vld [vmem:[#allocation5 + $0x98] sm:$0xff] }
 0x2e6   :  { %v1698_v36 = vadd.f32 %v1697_v51, %v1680_v30  ;;  %v3508_v30 = vld [vmem:[#allocation5 + $0x50] sm:$0xff] }
 0x2e7   :  { %v1646_v48 = vpop.f32.mrf.mxu3  ;;  %2190 = vmatpush.bf16.msrb.mxu1 %v3503_v1  ;;  %v3541_v1 = vld [vmem:[%s4675_s9 + $0x18] sm:$0xff] }
 0x2e8   :  { %v1738_v63 = vpop.f32.mrf.mxu0  ;;  %v1647_v4 = vadd.f32 %v1646_v48, %v1628_v22  ;;  %v1756_v35 = vpop.f32.mrf.mxu1  ;;  %v3496_v22 = vld [vmem:[%s4672_s6] sm:$0xff]  ;;  %v3524_v48 = vld [vmem:[#allocation5 + $0xd0] sm:$0xff] }
 0x2e9   :  { %v3535_v63 = vld [vmem:[#allocation5 + $0x128] sm:$0xff] }
 0x2ea   :  { %v1665_v7 = vadd.f32 %v1664_v3, %v1647_v4  ;;  %v3507_v4 = vld [vmem:[#allocation5 + $0x48] sm:$0xff] }
 0x2eb   :  { %v3515_v35 = vld [vmem:[#allocation5 + $0x88] sm:$0xff] }
 0x2ec   :  { %v1774_v46 = vpop.f32.mrf.mxu2  ;;  %v1683_v53 = vadd.f32 %v1682_v59, %v1665_v7  ;;  %v3523_v7 = vld [vmem:[#allocation5 + $0xc8] sm:$0xff] }
 0x2ed   :  { %v3534_v46 = vld [vmem:[#allocation5 + $0x120] sm:$0xff] }
 0x2ee   :  { %v1701_v39 = vadd.f32 %v1700_v6, %v1683_v53  ;;  %v3502_v6 = vld [vmem:[#allocation5 + $0x20] sm:$0xff] }
 0x2ef   :  { %v1648_v55 = vpop.f32.mrf.mxu3  ;;  %2191 = vmatpush.bf16.msrb.mxu1 %v3502_v6  ;;  %v3506_v53 = vld [vmem:[#allocation5 + $0x40] sm:$0xff] }
 0x2f0   :  { %v3533_v55 = vld [vmem:[#allocation5 + $0x118] sm:$0xff]  ;;  %v3538_v6 = vld [vmem:[%s4675_s9] sm:$0xff] }
 0x2f3   :  { %2192 = vmatpush.bf16.msrb.mxu1 %v3501_v24  ;;  %v3552_v24 = vld [vmem:[%s4677_s11 + $0x30] sm:$0xff] }
 0x2f7   :  { %v1713_v11 = vpop.f32.mrf.mxu3  ;;  %2193 = vmatpush.bf16.msrb.mxu1 %v3500_v31  ;;  %v3550_v31 = vld [vmem:[%s4677_s11 + $0x20] sm:$0xff] }
 0x2f8   :  { %v1732_v14 = vadd.f32 %v1731_v33, %v1713_v11  ;;  %v3512_v33 = vld [vmem:[#allocation5 + $0x70] sm:$0xff]  ;;  %v3522_v11 = vld [vmem:[#allocation5 + $0xc0] sm:$0xff] }
 0x2f9   :  { %2202 = vmatpush.bf16.msrb.mxu2 %v3512_v33  ;;  %v3563_v33 = vld [vmem:[%s4674_s8] ss:$0 sm:$0xff] }
 0x2fa   :  { %v1750_v13 = vadd.f32 %v1749_v10, %v1732_v14  ;;  %v3520_v10 = vld [vmem:[#allocation5 + $0xb0] sm:$0xff] }
 0x2fb   :  { %2215 = vmatpush.bf16.msra.mxu3 %v3520_v10 }
 0x2fc   :  { %v1768_v15 = vadd.f32 %v1767_v37, %v1750_v13  ;;  %v3499_v37 = vld [vmem:[#allocation5 + $0x8] sm:$0xff]  ;;  %v3532_v13 = vld [vmem:[#allocation5 + $0x110] sm:$0xff] }
 0x2fd   :  { %2194 = vmatpush.bf16.msrb.mxu1 %v3499_v37  ;;  %v3549_v37 = vld [vmem:[%s4677_s11 + $0x18] sm:$0xff] }
 0x2ff   :  { %v1715_v18 = vpop.f32.mrf.mxu3 }
 0x300   :  { %v1734_v19 = vadd.f32 %v1733_v61, %v1715_v18  ;;  %v3511_v61 = vld [vmem:[#allocation5 + $0x68] sm:$0xff] }
 0x301   :  { %2203 = vmatpush.bf16.msrb.mxu2 %v3511_v61  ;;  %2195 = vmatpush.bf16.msrb.mxu1 %v3498_v38 }
 0x302   :  { %v1752_v20 = vadd.f32 %v1751_v2, %v1734_v19  ;;  %v3519_v2 = vld [vmem:[#allocation5 + $0xa8] sm:$0xff]  ;;  %v3530_v19 = vld [vmem:[#allocation5 + $0x100] sm:$0xff] }
 0x303   :  { %2216 = vmatpush.bf16.msra.mxu3 %v3519_v2 }
 0x304   :  { %v1770_v49 = vadd.f32 %v1769_v43, %v1752_v20  ;;  %v3510_v43 = vld [vmem:[#allocation5 + $0x60] sm:$0xff]  ;;  %v3545_v20 = vld [vmem:[%s4675_s9 + $0x38] sm:$0xff] }
 0x305   :  { %2204 = vmatpush.bf16.msrb.mxu2 %v3510_v43  ;;  %2240 = vmatpush.bf16.msra.mxu1 %v3537_v23  ;;  %v3548_v43 = vld [vmem:[%s4677_s11 + $0x10] sm:$0xff] }
 0x307   :  { %v1718_v58 = vpop.f32.mrf.mxu3 }
 0x308   :  { %v1737_v62 = vadd.f32 %v1736_v45, %v1718_v58  ;;  %v3509_v45 = vld [vmem:[#allocation5 + $0x58] sm:$0xff]  ;;  %v3562_v58 = vld [vmem:[%s4671_s5] ss:$0 sm:$0xff] }
 0x309   :  { %2205 = vmatpush.bf16.msrb.mxu2 %v3509_v45  ;;  %2241 = vmatpush.bf16.msra.mxu1 %v3536_v57 }
 0x30a   :  { %v1755_v16 = vadd.f32 %v1754_v17, %v1737_v62  ;;  %v3526_v17 = vld [vmem:[#allocation5 + $0xe0] sm:$0xff] }
 0x30c   :  { %v1773_v12 = vadd.f32 %v1772_v27, %v1755_v16  ;;  %v3525_v27 = vld [vmem:[#allocation5 + $0xd8] sm:$0xff] }
 0x30d   :  { %2206 = vmatpush.bf16.msrb.mxu2 %v3508_v30  ;;  %2242 = vmatpush.bf16.msra.mxu1 %v3535_v63  ;;  %v3546_v63 = vld [vmem:[%s4677_s11] sm:$0xff] }
 0x30f   :  { %v1720_v0 = vpop.f32.mrf.mxu3 }
 0x311   :  { %2207 = vmatpush.bf16.msrb.mxu2 %v3507_v4  ;;  %2243 = vmatpush.bf16.msra.mxu1 %v3534_v46  ;;  %v3564_v4 = vld [vmem:[%s4676_s10] ss:$0 sm:$0xff] }
 0x315   :  { %2208 = vmatpush.bf16.msrb.mxu2 %v3506_v53  ;;  %2244 = vmatpush.bf16.msra.mxu1 %v3533_v55  ;;  %v3565_v55 = vld [vmem:[%s4678_s12] ss:$0 sm:$0xff] }
 0x317   :  { %v1785_v50 = vpop.f32.mrf.mxu3 }
 0x318   :  { %v1786_v54 = vadd.f32 %v1785_v50, %v1768_v15  ;;  %v3531_v15 = vld [vmem:[#allocation5 + $0x108] sm:$0xff] }
 0x319   :  { %2245 = vmatpush.bf16.msra.mxu1 %v3532_v13  ;;  %2323 = vmatpush.bf16.msra.mxu2 %v3545_v20 }
 0x31a   :  { %v1794_v21 = vmax.f32 %v1696_v52, %v1786_v54  ;;  %v3518_v52 = vld [vmem:[#allocation5 + $0xa0] sm:$0xff] }
 0x31b   :  { %2217 = vmatpush.bf16.msra.mxu3 %v3518_v52 }
 0x31d   :  { %2246 = vmatpush.bf16.msra.mxu1 %v3531_v15 }
 0x31f   :  { %v1787_v40 = vpop.f32.mrf.mxu3  ;;  %2218 = vmatpush.bf16.msra.mxu3 %v3517_v60 }
 0x320   :  { %v1788_v42 = vadd.f32 %v1787_v40, %v1770_v49  ;;  %v3544_v49 = vld [vmem:[%s4675_s9 + $0x30] sm:$0xff] }
 0x321   :  { %2247 = vmatpush.bf16.msra.mxu1 %v3530_v19  ;;  %2324 = vmatpush.bf16.msra.mxu2 %v3544_v49 }
 0x322   :  { %v1795_v34 = vmax.f32 %v1698_v36, %v1788_v42  ;;  %v3516_v36 = vld [vmem:[#allocation5 + $0x90] sm:$0xff] }
 0x323   :  { %2219 = vmatpush.bf16.msra.mxu3 %v3516_v36 }
 0x324   :  { %v1801_v9 = vpack.c.bf16 %v1795_v34, %v1794_v21 }
 0x327   :  { %v1790_v5 = vpop.f32.mrf.mxu3  ;;  %2220 = vmatpush.bf16.msra.mxu3 %v3515_v35 }
 0x328   :  { %v1791_v44 = vadd.f32 %v1790_v5, %v1773_v12 }
 0x32a   :  { %v1796_v56 = vmax.f32 %v1701_v39, %v1791_v44  ;;  %v3514_v39 = vld [vmem:[#allocation5 + $0x80] sm:$0xff] }
 0x32b   :  { %2221 = vmatpush.bf16.msra.mxu3 %v3514_v39 }
 0x32c   :  { %v1802_v51 = vpack.c.bf16 %v1796_v56, %v1796_v56  ;;  %v3543_v56 = vld [vmem:[%s4675_s9 + $0x28] sm:$0xff] }
 0x32d   :  { %2325 = vmatpush.bf16.msra.mxu2 %v3543_v56 }
 0x32e   :  { %v1821_v3 = vsel %vm144_vm5, %v1802_v51, 0  ;;  %v3542_v51 = vld [vmem:[%s4675_s9 + $0x20] sm:$0xff] }
 0x32f   :  { %v1792_v59 = vpop.f32.mrf.mxu3  ;;  %1829 = vmatpush.bf16.msrb.mxu0 %v1821_v3  ;;  %v3540_v3 = vld [vmem:[%s4675_s9 + $0x10] sm:$0xff] }
 0x330   :  { %v3539_v59 = vld [vmem:[%s4675_s9 + $0x8] sm:$0xff] }
 0x331   :  { %2326 = vmatpush.bf16.msra.mxu2 %v3542_v51 }
 0x333   :  { %1830 = vmatpush.bf16.msrb.mxu0 %v1801_v9 }
 0x335   :  { %2327 = vmatpush.bf16.msra.mxu2 %v3541_v1 }
 0x336   :  { %3106 = vmatmul.msk.bf16.vlgmr.msrb.gmra.mxu0 %vm1813_vm8, %v3496_v22  ;;  %v3553_v22 = vld [vmem:[%s4677_s11 + $0x38] sm:$0xff] }
 0x337   :  { %2227 = vmatpush.bf16.msra.mxu0 %v3529_v29  ;;  %2406 = vmatpush.bf16.msrb.mxu3 %v3553_v22 }
 0x339   :  { %2328 = vmatpush.bf16.msra.mxu2 %v3540_v3 }
 0x33b   :  { %2228 = vmatpush.bf16.msra.mxu0 %v3528_v26  ;;  %2407 = vmatpush.bf16.msrb.mxu3 %v3552_v24 }
 0x33d   :  { %2329 = vmatpush.bf16.msra.mxu2 %v3539_v59 }
 0x33f   :  { %2229 = vmatpush.bf16.msra.mxu0 %v3527_v41 }
 0x341   :  { %2330 = vmatpush.bf16.msra.mxu2 %v3538_v6 }
 0x343   :  { %2230 = vmatpush.bf16.msra.mxu0 %v3526_v17 }
 0x346   :  { %3107 = vmatmul.msk.bf16.gmra.mxu0 %vm1813_vm8, %v3497_v8  ;;  %v3551_v8 = vld [vmem:[%s4677_s11 + $0x28] sm:$0xff] }
 0x347   :  { %2231 = vmatpush.bf16.msra.mxu0 %v3525_v27  ;;  %2408 = vmatpush.bf16.msrb.mxu3 %v3551_v8 }
 0x34b   :  { %2232 = vmatpush.bf16.msra.mxu0 %v3524_v48  ;;  %2409 = vmatpush.bf16.msrb.mxu3 %v3550_v31  ;;  %v3547_v48 = vld [vmem:[%s4677_s11 + $0x8] sm:$0xff]  ;;  %s2427_s11 = sshll.u32 %s4679_s13, 4  ;;  %s2428_s11 = int_to_ptr.hbm [resolvable:$true] %s2427_s11 }
 0x34f   :  { %2233 = vmatpush.bf16.msra.mxu0 %v3523_v7  ;;  %2410 = vmatpush.bf16.msrb.mxu3 %v3549_v37 }
 0x353   :  { %2234 = vmatpush.bf16.msra.mxu0 %v3522_v11  ;;  %2411 = vmatpush.bf16.msrb.mxu3 %v3548_v43 }
 0x357   :  { %2412 = vmatpush.bf16.msrb.mxu3 %v3547_v48 }
 0x35b   :  { %2413 = vmatpush.bf16.msrb.mxu3 %v3546_v63 }
 0x3b3   :  { %v1832_v14 = vpop.f32.mrf.mxu0 }
 0x3bb   :  { %v1834_v18 = vpop.f32.mrf.mxu0 }
 0x3c3   :  { %v1837_v62 = vpop.f32.mrf.mxu0 }
 0x3c4   :  { %v1842_v16 = vmax.f32 %v1832_v14, %v1837_v62 }
 0x3c6   :  { %v1848_v12 = vadd.f32 %v3562_v58, %v1842_v16 }
 0x3c8   :  { %v1850_v0 = vmax.f32 %v1848_v12, 0.0 }
 0x3ca   :  { %v1853_v50 = vrot.slane %v1850_v0, 2  ;;  %v1855_v54 = vrot.slane %v1850_v0, 4  ;;  %v1857_v21 = vrot.slane %v1850_v0, 6  ;;  %v1859_v40 = vpack.c.bf16 %v1850_v0, %v1850_v0 }
 0x3cb   :  { %v1839_v42 = vpop.f32.mrf.mxu0 }
 0x3cc   :  { %v1860_v34 = vpack.c.bf16 %v1853_v50, %v1853_v50  ;;  %v1861_v9 = vpack.c.bf16 %v1855_v54, %v1855_v54  ;;  %v1862_v25 = vpack.c.bf16 %v1857_v21, %v1857_v21  ;;  %2196 = vmatmul.bf16.vlgmr.msrb.gmra.mxu1 %v1859_v40  ;;  %v1843_v5 = vmax.f32 %v1834_v18, %v1839_v42 }
 0x3ce   :  { %2209 = vmatmul.bf16.vlgmr.msrb.gmra.mxu2 %v1860_v34  ;;  %2222 = vmatmul.bf16.vlgmr.msra.gmra.mxu3 %v1861_v9  ;;  %v1849_v28 = vadd.f32 %v3562_v58, %v1843_v5 }
 0x3cf   :  { %2235 = vmatmul.bf16.vlgmr.msra.gmra.mxu0 %v1862_v25 }
 0x3d0   :  { %v1851_v44 = vmax.f32 %v1849_v28, 0.0 }
 0x3d2   :  { %v1863_v47 = vpack.c.bf16 %v1851_v44, %v1851_v44 }
 0x3dc   :  { %2248 = vmatmul.bf16.vlgmr.msra.gmra.mxu1 %v1863_v47 }
 0x449   :  { %v2197_v32 = vpop.f32.mrf.mxu1 }
 0x44a   :  { %v2198_v29 = vadd.f32 %v3563_v33, %v2197_v32 }
 0x44c   :  { %v2236_v10 = vpop.f32.mrf.mxu0 }
 0x451   :  { %v2199_v61 = vpop.f32.mrf.mxu1  ;;  %v2210_v26 = vpop.f32.mrf.mxu2 }
 0x452   :  { %v2211_v2 = vadd.f32 %v2210_v26, %v2198_v29  ;;  %v2223_v38 = vpop.f32.mrf.mxu3 }
 0x454   :  { %v2224_v23 = vadd.f32 %v2223_v38, %v2211_v2  ;;  %v2238_v52 = vpop.f32.mrf.mxu0 }
 0x456   :  { %v2237_v41 = vadd.f32 %v2236_v10, %v2224_v23 }
 0x459   :  { %v2249_v45 = vpop.f32.mrf.mxu1  ;;  %v2212_v57 = vpop.f32.mrf.mxu2 }
 0x45a   :  { %v2250_v17 = vadd.f32 %v2249_v45, %v2237_v41  ;;  %v2225_v60 = vpop.f32.mrf.mxu3 }
 0x45c   :  { %v2253_v27 = vmax.f32 %v2250_v17, 0.0 }
 0x45e   :  { %v2254_v30 = vpack.c.bf16 %v2253_v27, %v2253_v27 }
 0x460   :  { %2331 = vmatmul.bf16.vlgmr.msra.gmra.mxu2 %v2254_v30 }
 0x461   :  { %v2251_v36 = vpop.f32.mrf.mxu1 }
 0x4e3   :  { %v2332_v35 = vpop.f32.mrf.mxu2 }
 0x4e4   :  { %v2333_v7 = vadd.f32 %v3564_v4, %v2332_v35 }
 0x4e6   :  { %v2336_v46 = vmax.f32 %v2333_v7, 0.0 }
 0x4e8   :  { %v2337_v53 = vpack.c.bf16 %v2336_v46, %v2336_v46 }
 0x4ea   :  { %2414 = vmatmul.bf16.vlgmr.msrb.gmra.mxu3 %v2337_v53 }
 0x4eb   :  { %v2334_v39 = vpop.f32.mrf.mxu2 }
 0x56d   :  { %v2415_v11 = vpop.f32.mrf.mxu3 }
 0x56e   :  { %v2416_v14 = vadd.f32 %v3565_v55, %v2415_v11 }
 0x570   :  { %2419 = vst [vmem:[#allocation7] sm:$0x3] %v2416_v14 }
 0x571   :  { %2430 = dma.vmem_to_hbm [thread:$0]  %s2426_s14, 32, %s2428_s11, [#allocation4]  }
 0x575   :  { %v2417_v13 = vpop.f32.mrf.mxu3 }
 0x576   :  { %3642 = dma.done.wait [#allocation4], 32  }
 0x577   :  { %3643 = vsyncadd [#allocation4], 4294967264 }
 0x578   :  { %2435 = vsyncpa [#allocation3], 1 }
 0x579   :  { %2436 = vsyncpa [#allocation6], 1 }
 0x57a   :  { %2437 = vsyncpa [#allocation4], 1 }

</bundles_post_ra>
